<compile_context>
chip_gen: v5e
topology: v5e:2x2
jax: 0.10.0
libtpu: 0.0.40
codegen_flags: <defaults>
</compile_context>

<pallas_src>
import functools

import jax
import jax.numpy as jnp
from jax.experimental import pallas as pl
from jax.experimental.pallas import tpu as pltpu


# ----------------------------------------------------------------------------
# Kernel A: x-independent parameter generation + lane-pack (runs once).
# ----------------------------------------------------------------------------
def param_gen_kernel(
    # w1 branch
    w1wT_ref,      # [F, M]   cat(adapter w_1 weights, dim=0).T
    w1b_ref,       # [1, M]   cat(adapter w_1 biases)
    stw1_w_ref,    # [M, G]   size_transform_w1 weight ([in, out])
    stw1_b_ref,    # [1, G]
    b11_w_ref,     # [M, Bn]  size_transform_for_bias1_1 ([in, out])
    b11_b_ref,     # [1, Bn]
    b12_w_ref,     # [Bn, G]  size_transform_for_bias1_2 ([in, out])
    b12_b_ref,     # [1, G]
    Ww1w_ref,      # [F, G]   W_for_w1_weight
    Bw1w_ref,      # [F, G]   B_for_w1_weight
    Ww1b_ref,      # [1, G]   W_for_w1_bias
    Bw1b_ref,      # [1, G]   B_for_w1_bias
    # w2 branch (generated directly in [G, F] orientation)
    stw2_wT_ref,   # [G, M]   size_transform_w2 weight (native torch layout)
    w2wT_ref,      # [M, F]   cat(adapter w_2 weights, dim=0).T
    stw2_b_ref,    # [G, 1]   size_transform_w2 bias (broadcasts over F in-kernel)
    w2b_ref,       # [1, F]   cat(adapter w_2 biases)
    b21_w_ref,     # [F, Bn]  size_transform_for_bias2_1 ([in, out])
    b21_b_ref,     # [1, Bn]
    b22_w_ref,     # [Bn, F]  size_transform_for_bias2_2 ([in, out])
    b22_b_ref,     # [1, F]
    Ww2w_ref,      # [G, F]   W_for_w2_weight (native layout, no host transpose)
    Bw2w_ref,      # [G, F]   B_for_w2_weight
    Ww2b_ref,      # [1, F]   W_for_w2_bias
    Bw2b_ref,      # [1, F]   B_for_w2_bias
    # outputs (lane-packed for Kernel B)
    w1w_out,       # [P*F, P*G]  block-diagonal
    w1b_out,       # [1, P*G]    lane-tiled
    w2w_out,       # [P*G, P*F]  block-diagonal
    w2b_out,       # [1, P*F]    lane-tiled
    *, pack,
):
    f32 = jnp.float32
    P = pack
    F, G = Ww1w_ref.shape

    # ---- generated w1 parameters ([F, G], [1, G]) ----
    w1w = jnp.dot(w1wT_ref[...], stw1_w_ref[...], preferred_element_type=f32) + stw1_b_ref[...]
    w1b = jnp.dot(w1b_ref[...], b11_w_ref[...], preferred_element_type=f32) + b11_b_ref[...]
    w1b = jnp.dot(w1b, b12_w_ref[...], preferred_element_type=f32) + b12_b_ref[...]
    w1w = jnp.tanh(w1w) * Ww1w_ref[...] + Bw1w_ref[...]
    w1b = jnp.tanh(w1b) * Ww1b_ref[...] + Bw1b_ref[...]

    # ---- generated w2 parameters directly in [G, F] / [1, F] ----
    # PyTorch computes (w2w_cat @ st_w2_w_in_out + b).T ; identity used here:
    #   (A @ W + b).T == W.T @ A.T + b[:, None]
    w2w = jnp.dot(stw2_wT_ref[...], w2wT_ref[...], preferred_element_type=f32) + stw2_b_ref[...]
    w2b = jnp.dot(w2b_ref[...], b21_w_ref[...], preferred_element_type=f32) + b21_b_ref[...]
    w2b = jnp.dot(w2b, b22_w_ref[...], preferred_element_type=f32) + b22_b_ref[...]
    w2w = jnp.tanh(w2w) * Ww2w_ref[...] + Bw2w_ref[...]
    w2b = jnp.tanh(w2b) * Ww2b_ref[...] + Bw2b_ref[...]

    if P == 1:   # no lane packing needed / possible
        w1w_out[...] = w1w
        w1b_out[...] = w1b
        w2w_out[...] = w2w
        w2b_out[...] = w2b
        return

    # ---- lane packing: block-diagonal weights / lane-tiled biases ----
    # Built from iota + compare + tiny identity matmuls only (no vector
    # int div/mod, no in-kernel reshape) so it lowers everywhere; this runs
    # once per forward and is negligible.
    def row_rep(dim):  # [P*dim, dim] : vertical stack of P identity matrices
        r = jax.lax.broadcasted_iota(jnp.int32, (P * dim, dim), 0)
        c = jax.lax.broadcasted_iota(jnp.int32, (P * dim, dim), 1)
        m = (r == c)
        for p_ in range(1, P):
            m = m | (r == c + p_ * dim)
        return m.astype(f32)

    def col_rep(dim):  # [dim, P*dim] : horizontal stack of P identity matrices
        r = jax.lax.broadcasted_iota(jnp.int32, (dim, P * dim), 0)
        c = jax.lax.broadcasted_iota(jnp.int32, (dim, P * dim), 1)
        m = (c == r)
        for p_ in range(1, P):
            m = m | (c == r + p_ * dim)
        return m.astype(f32)

    def blk_mask(rows, cols):  # [P*rows, P*cols] block-diagonal boolean mask
        r = jax.lax.broadcasted_iota(jnp.int32, (P * rows, P * cols), 0)
        c = jax.lax.broadcasted_iota(jnp.int32, (P * rows, P * cols), 1)
        m = None
        for p_ in range(P):
            blk = ((r >= p_ * rows) & (r < (p_ + 1) * rows) &
                   (c >= p_ * cols) & (c < (p_ + 1) * cols))
            m = blk if m is None else (m | blk)
        return m

    rF, rG = row_rep(F), row_rep(G)
    cF, cG = col_rep(F), col_rep(G)

    w1w_full = jnp.dot(jnp.dot(rF, w1w, preferred_element_type=f32), cG,
                       preferred_element_type=f32)              # every block = w1w
    w1w_out[...] = jnp.where(blk_mask(F, G), w1w_full, 0.0)
    w1b_out[...] = jnp.dot(w1b, cG, preferred_element_type=f32)  # lane-tiled bias

    w2w_full = jnp.dot(jnp.dot(rG, w2w, preferred_element_type=f32), cF,
                       preferred_element_type=f32)
    w2w_out[...] = jnp.where(blk_mask(G, F), w2w_full, 0.0)
    w2b_out[...] = jnp.dot(w2b, cF, preferred_element_type=f32)


# ----------------------------------------------------------------------------
# Kernel B: apply the generated adapter to lane-packed x, tiled over rows.
# ----------------------------------------------------------------------------
def adapter_apply_kernel(x_ref, w1_ref, b1_ref, w2_ref, b2_ref, out_ref):
    f32 = jnp.float32
    # s1 = relu(x @ W1_bd + b1)        (dropout = identity in eval mode)
    s1 = jnp.dot(x_ref[...], w1_ref[...], preferred_element_type=f32) + b1_ref[...]
    s1 = jnp.maximum(s1, 0.0)
    # s2 = s1 @ W2_bd + b2             (block-diagonal -> plain MXU dot, K=P*G)
    s2 = jnp.dot(s1, w2_ref[...], preferred_element_type=f32) + b2_ref[...]
    out_ref[...] = s2.astype(out_ref.dtype)


def parameter_generator_adapter_forward(x, p, *, tile_rows_max=2048):
    """x: [B, S, F] float32.  p: dict of parameter arrays (see __main__)."""
    B, S, F = x.shape
    BS = B * S
    G = p["st_w1_w"].shape[1]
    f32 = jnp.float32

    # Lane-pack factor: pack P logical rows per physical row so the packed
    # feature dim P*F fills all 128 lanes (P=4 at F=32 -> K=128, matching the
    # v5e 128x128 MXU; unmasked stores everywhere).  Falls back to P=1.
    P = 128 // F if (F <= 128 and 128 % F == 0) else 1

    vmem = pl.BlockSpec(memory_space=pltpu.MemorySpace.VMEM)

    # ---- 1) x-independent parameter generation (one small un-gridded call) ----
    gen_args = [
        p["w1w_cat_T"], p["w1b_cat"][None, :],
        p["st_w1_w"], p["st_w1_b"][None, :],
        p["b11_w"], p["b11_b"][None, :],
        p["b12_w"], p["b12_b"][None, :],
        p["W_w1w"], p["B_w1w"],
        p["W_w1b"][None, :], p["B_w1b"][None, :],
        p["st_w2_w_t"], p["w2w_cat_T"],
        p["st_w2_b"][:, None],
        p["w2b_cat"][None, :],
        p["b21_w"], p["b21_b"][None, :],
        p["b22_w"], p["b22_b"][None, :],
        p["W_w2w"], p["B_w2w"],
        p["W_w2b"][None, :], p["B_w2b"][None, :],
    ]
    w1_bd, b1_bd, w2_bd, b2_bd = pl.pallas_call(
        functools.partial(param_gen_kernel, pack=P),
        out_shape=(
            jax.ShapeDtypeStruct((P * F, P * G), f32),
            jax.ShapeDtypeStruct((1, P * G), f32),
            jax.ShapeDtypeStruct((P * G, P * F), f32),
            jax.ShapeDtypeStruct((1, P * F), f32),
        ),
        in_specs=[vmem] * len(gen_args),
        out_specs=(vmem, vmem, vmem, vmem),
    )(*gen_args)

    # ---- 2) lane-packed, gridded apply over rows ----
    # x stays f32: no wrapper-side dtype cast (that would be an extra HBM pass).
    x2d = x.reshape(BS, F)
    BS_pad = -(-BS // P) * P
    if BS_pad != BS:
        x2d = jnp.pad(x2d, ((0, BS_pad - BS), (0, 0)))
    rows = BS_pad // P
    xp = x2d.reshape(rows, P * F)          # bit-identical row-major reshape

    # Tile: as big as possible to amortize per-grid-step overhead (~0.35 us),
    # but always >=2 tiles when rows allow so v7x's two TensorCores both get
    # work under "parallel".  VMEM: 2048x128 f32 tile = 1 MiB (x) + 1 MiB (out),
    # double-buffered ~4 MiB, far below scoped limits on every generation.
    if rows <= 8:
        tile = rows
    else:
        tile = min(tile_rows_max, -(-rows // 2))
        tile = max(8, (tile // 8) * 8)
    n_tiles = pl.cdiv(rows, tile)

    cost = pl.CostEstimate(
        flops=2 * rows * (P * F) * (P * G) * 2,            # two packed matmuls
        transcendentals=0,
        bytes_accessed=rows * (P * F) * 4 * 2              # f32 x in + f32 out
                       + 2 * (P * F) * (P * G) * 4         # resident weights
                       + (P * G + P * F) * 4,              # resident biases
    )

    out = pl.pallas_call(
        adapter_apply_kernel,
        # NOTE: switch to bf16 here (and in the final store) if downstream
        # accepts it — cuts Kernel B HBM traffic ~33% (biggest win on v7x).
        out_shape=jax.ShapeDtypeStruct((rows, P * F), f32),
        grid_spec=pltpu.PrefetchScalarGridSpec(
            num_scalar_prefetch=0,
            grid=(n_tiles,),
            in_specs=[
                pl.BlockSpec((tile, P * F), lambda i: (i, 0)),     # x tile
                pl.BlockSpec((P * F, P * G), lambda i: (0, 0)),    # W1_bd (resident)
                pl.BlockSpec((1, P * G), lambda i: (0, 0)),        # b1 (resident)
                pl.BlockSpec((P * G, P * F), lambda i: (0, 0)),    # W2_bd (resident)
                pl.BlockSpec((1, P * F), lambda i: (0, 0)),        # b2 (resident)
            ],
            out_specs=pl.BlockSpec((tile, P * F), lambda i: (i, 0)),
        ),
        compiler_params=pltpu.CompilerParams(
            dimension_semantics=("parallel",),     # independent tiles; v7x: 2 TCs
        ),
        cost_estimate=cost,
    )(xp, w1_bd, b1_bd, w2_bd, b2_bd)

    out = out.reshape(BS_pad, F)[:BS]
    return out.reshape(B, S, F)


def reference_forward(x, p):
    """Pure-JAX f32 reference mirroring the PyTorch module (eval mode)."""
    hi = "highest"
    w1w = jnp.dot(p["w1w_cat_T"], p["st_w1_w"], precision=hi) + p["st_w1_b"]
    w1b = jnp.dot(jnp.dot(p["w1b_cat"], p["b11_w"], precision=hi) + p["b11_b"],
                  p["b12_w"], precision=hi) + p["b12_b"]
    w1w = jnp.tanh(w1w) * p["W_w1w"] + p["B_w1w"]
    w1b = jnp.tanh(w1b) * p["W_w1b"] + p["B_w1b"]

    # size_transform_w2(cat(w2_weight)) then transpose -> [G, F]
    w2w = (jnp.dot(p["w2w_cat_T"].T, p["st_w2_w_t"].T, precision=hi) + p["st_w2_b"]).T
    w2b = jnp.dot(jnp.dot(p["w2b_cat"], p["b21_w"], precision=hi) + p["b21_b"],
                  p["b22_w"], precision=hi) + p["b22_b"]
    w2w = jnp.tanh(w2w) * p["W_w2w"] + p["B_w2w"]
    w2b = jnp.tanh(w2b) * p["W_w2b"] + p["B_w2b"]

    B, S, F = x.shape
    x2d = x.reshape(B * S, F)
    s1 = jnp.maximum(jnp.dot(x2d, w1w, precision=hi) + w1b, 0.0)
    s2 = jnp.dot(s1, w2w, precision=hi) + w2b
    return s2.reshape(B, S, F)


if __name__ == "__main__":
    # small shapes implied by the module
    B, S = 2, 8                 # batch, sequence
    F = 32                      # feature_size
    M = 64                      # sum_memory_dim (single used adapter, memory_count=64)
    G = 16                      # generate_dim
    Bn = 8                      # bottleneck_dim

    key = jax.random.PRNGKey(0)
    ks = jax.random.split(key, 17)

    def init(k, shape, scale=0.1):
        return (scale * jax.random.normal(k, shape)).astype(jnp.float32)

    # synthetic adapter weights for the single used domain:
    #   w_1: Linear(F -> M)  weight [M, F], bias [M]
    #   w_2: Linear(M -> F)  weight [F, M], bias [F]
    a_w1_w = init(ks[0], (M, F))
    a_w1_b = init(ks[1], (M,))
    a_w2_w = init(ks[2], (F, M))
    a_w2_b = init(ks[3], (F,))

    # NOTE: all layout prep (adapter concatenation / [in,out] weight orientation)
    # is one-time parameter setup, not per-forward work.
    p = {
        "w1w_cat_T": a_w1_w.T,              # [F, M]
        "w1b_cat":   a_w1_b,                # [M]
        "w2w_cat_T": a_w2_w.T,              # [M, F]
        "w2b_cat":   a_w2_b,                # [F]  (feature_size * len(used_adapters))
        "st_w1_w":   init(ks[4], (M, G)),  "st_w1_b": init(ks[5], (G,)),
        "st_w2_w_t": init(ks[6], (G, M)),  "st_w2_b": init(ks[7], (G,)),
        "b11_w": init(ks[8], (M, Bn)),  "b11_b": init(ks[9], (Bn,)),
        "b12_w": init(ks[10], (Bn, G)), "b12_b": init(ks[11], (G,)),
        "b21_w": init(ks[12], (F, Bn)), "b21_b": init(ks[13], (Bn,)),
        "b22_w": init(ks[14], (Bn, F)), "b22_b": init(ks[15], (F,)),
        # modulation parameters (as in __init__: ones / zeros), native layouts
        "W_w1w": jnp.ones((F, G), jnp.float32), "B_w1w": jnp.zeros((F, G), jnp.float32),
        "W_w1b": jnp.ones((G,), jnp.float32),   "B_w1b": jnp.zeros((G,), jnp.float32),
        "W_w2w": jnp.ones((G, F), jnp.float32), "B_w2w": jnp.zeros((G, F), jnp.float32),
        "W_w2b": jnp.ones((F,), jnp.float32),   "B_w2b": jnp.zeros((F,), jnp.float32),
    }

    x = jax.random.normal(ks[16], (B, S, F), dtype=jnp.float32)

    fwd = jax.jit(parameter_generator_adapter_forward)
    out = jax.block_until_ready(fwd(x, p))

    ref = reference_forward(x, p)

    assert out.shape == (B, S, F)
    assert jnp.allclose(out, ref, atol=2e-2, rtol=2e-2), "mismatch vs f32 reference"

    print("KERNEL_OK")
</pallas_src>

<mosaic_0001>
module attributes {stable_mosaic.version = 11 : i64} {
  func.func @adapter_apply_kernel(%arg0: i32, %arg1: memref<4x128xf32, #tpu.memory_space<vmem>>, %arg2: memref<128x64xf32, #tpu.memory_space<vmem>>, %arg3: memref<1x64xf32, #tpu.memory_space<vmem>>, %arg4: memref<64x128xf32, #tpu.memory_space<vmem>>, %arg5: memref<1x128xf32, #tpu.memory_space<vmem>>, %arg6: memref<4x128xf32, #tpu.memory_space<vmem>>) attributes {dimension_semantics = [#tpu.dimension_semantics<parallel>], iteration_bounds = array<i64: 1>, scalar_prefetch = 0 : i64, scratch_operands = 0 : i64, tpu.core_type = #tpu.core_type<tc>, window_params = [{transform_indices = @transform_0, window_bounds = array<i64: 4, 128>}, {pipeline_mode = #tpu.pipeline_mode<synchronous>, transform_indices = @transform_1, window_bounds = array<i64: 128, 64>}, {pipeline_mode = #tpu.pipeline_mode<synchronous>, transform_indices = @transform_2, window_bounds = array<i64: 1, 64>}, {pipeline_mode = #tpu.pipeline_mode<synchronous>, transform_indices = @transform_3, window_bounds = array<i64: 64, 128>}, {pipeline_mode = #tpu.pipeline_mode<synchronous>, transform_indices = @transform_4, window_bounds = array<i64: 1, 128>}, {transform_indices = @transform_5, window_bounds = array<i64: 4, 128>}]} {
    %c0 = arith.constant 0 : index
    %c0_0 = arith.constant 0 : index
    %0 = vector.load %arg1[%c0, %c0_0] : memref<4x128xf32, #tpu.memory_space<vmem>>, vector<4x128xf32>
    %c0_1 = arith.constant 0 : index
    %c0_2 = arith.constant 0 : index
    %1 = vector.load %arg2[%c0_1, %c0_2] : memref<128x64xf32, #tpu.memory_space<vmem>>, vector<128x64xf32>
    %cst = arith.constant dense<0.000000e+00> : vector<4x64xf32>
    %2 = tpu.matmul %0, %1, %cst {dimension_numbers = #tpu.dot_dimension_numbers<[1], [0], [0], [1], [0, 0, 1, 1], [], []>} : vector<4x128xf32>, vector<128x64xf32>, vector<4x64xf32> -> vector<4x64xf32>
    %c0_3 = arith.constant 0 : index
    %c0_4 = arith.constant 0 : index
    %3 = vector.load %arg3[%c0_3, %c0_4] : memref<1x64xf32, #tpu.memory_space<vmem>>, vector<1x64xf32>
    %4 = vector.broadcast %3 : vector<1x64xf32> to vector<4x64xf32>
    %5 = arith.addf %2, %4 : vector<4x64xf32>
    %cst_5 = arith.constant 0.000000e+00 : f32
    %6 = vector.broadcast %cst_5 : f32 to vector<4x64xf32>
    %7 = arith.maximumf %5, %6 : vector<4x64xf32>
    %c0_6 = arith.constant 0 : index
    %c0_7 = arith.constant 0 : index
    %8 = vector.load %arg4[%c0_6, %c0_7] : memref<64x128xf32, #tpu.memory_space<vmem>>, vector<64x128xf32>
    %cst_8 = arith.constant dense<0.000000e+00> : vector<4x128xf32>
    %9 = tpu.matmul %7, %8, %cst_8 {dimension_numbers = #tpu.dot_dimension_numbers<[1], [0], [0], [1], [0, 0, 1, 1], [], []>} : vector<4x64xf32>, vector<64x128xf32>, vector<4x128xf32> -> vector<4x128xf32>
    %c0_9 = arith.constant 0 : index
    %c0_10 = arith.constant 0 : index
    %10 = vector.load %arg5[%c0_9, %c0_10] : memref<1x128xf32, #tpu.memory_space<vmem>>, vector<1x128xf32>
    %11 = vector.broadcast %10 : vector<1x128xf32> to vector<4x128xf32>
    %12 = arith.addf %9, %11 : vector<4x128xf32>
    %c0_11 = arith.constant 0 : index
    %c0_12 = arith.constant 0 : index
    %13 = vector.load %arg6[%c0_11, %c0_12] : memref<4x128xf32, #tpu.memory_space<vmem>>, vector<4x128xf32>
    tpu.vector_store %arg6[%c0_11, %c0_12], %12 {strides = array<i32>} : memref<4x128xf32, #tpu.memory_space<vmem>>, vector<4x128xf32>,
    return
  }
  func.func @transform_0(%arg0: i32) -> (i32, i32) {
    %c0_i32 = arith.constant 0 : i32
    %c0_i32_0 = arith.constant 0 : i32
    return %arg0, %c0_i32 : i32, i32
  }
  func.func @transform_1(%arg0: i32) -> (i32, i32) {
    %c0_i32 = arith.constant 0 : i32
    %c0_i32_0 = arith.constant 0 : i32
    %c0_i32_1 = arith.constant 0 : i32
    return %c0_i32, %c0_i32_0 : i32, i32
  }
  func.func @transform_2(%arg0: i32) -> (i32, i32) {
    %c0_i32 = arith.constant 0 : i32
    %c0_i32_0 = arith.constant 0 : i32
    %c0_i32_1 = arith.constant 0 : i32
    return %c0_i32, %c0_i32_0 : i32, i32
  }
  func.func @transform_3(%arg0: i32) -> (i32, i32) {
    %c0_i32 = arith.constant 0 : i32
    %c0_i32_0 = arith.constant 0 : i32
    %c0_i32_1 = arith.constant 0 : i32
    return %c0_i32, %c0_i32_0 : i32, i32
  }
  func.func @transform_4(%arg0: i32) -> (i32, i32) {
    %c0_i32 = arith.constant 0 : i32
    %c0_i32_0 = arith.constant 0 : i32
    %c0_i32_1 = arith.constant 0 : i32
    return %c0_i32, %c0_i32_0 : i32, i32
  }
  func.func @transform_5(%arg0: i32) -> (i32, i32) {
    %c0_i32 = arith.constant 0 : i32
    %c0_i32_0 = arith.constant 0 : i32
    return %arg0, %c0_i32 : i32, i32
  }
}

module attributes {stable_mosaic.version = 11 : i64} {
  func.func @param_gen_kernel(%arg0: memref<32x64xf32, #tpu.memory_space<vmem>>, %arg1: memref<1x64xf32, #tpu.memory_space<vmem>>, %arg2: memref<64x16xf32, #tpu.memory_space<vmem>>, %arg3: memref<1x16xf32, #tpu.memory_space<vmem>>, %arg4: memref<64x8xf32, #tpu.memory_space<vmem>>, %arg5: memref<1x8xf32, #tpu.memory_space<vmem>>, %arg6: memref<8x16xf32, #tpu.memory_space<vmem>>, %arg7: memref<1x16xf32, #tpu.memory_space<vmem>>, %arg8: memref<32x16xf32, #tpu.memory_space<vmem>>, %arg9: memref<32x16xf32, #tpu.memory_space<vmem>>, %arg10: memref<1x16xf32, #tpu.memory_space<vmem>>, %arg11: memref<1x16xf32, #tpu.memory_space<vmem>>, %arg12: memref<16x64xf32, #tpu.memory_space<vmem>>, %arg13: memref<64x32xf32, #tpu.memory_space<vmem>>, %arg14: memref<16x1xf32, #tpu.memory_space<vmem>>, %arg15: memref<1x32xf32, #tpu.memory_space<vmem>>, %arg16: memref<32x8xf32, #tpu.memory_space<vmem>>, %arg17: memref<1x8xf32, #tpu.memory_space<vmem>>, %arg18: memref<8x32xf32, #tpu.memory_space<vmem>>, %arg19: memref<1x32xf32, #tpu.memory_space<vmem>>, %arg20: memref<16x32xf32, #tpu.memory_space<vmem>>, %arg21: memref<16x32xf32, #tpu.memory_space<vmem>>, %arg22: memref<1x32xf32, #tpu.memory_space<vmem>>, %arg23: memref<1x32xf32, #tpu.memory_space<vmem>>, %arg24: memref<128x64xf32, #tpu.memory_space<vmem>>, %arg25: memref<1x64xf32, #tpu.memory_space<vmem>>, %arg26: memref<64x128xf32, #tpu.memory_space<vmem>>, %arg27: memref<1x128xf32, #tpu.memory_space<vmem>>) attributes {dimension_semantics = [], scalar_prefetch = 0 : i64, scratch_operands = 0 : i64, tpu.core_type = #tpu.core_type<tc>} {
    %c0 = arith.constant 0 : index
    %c0_0 = arith.constant 0 : index
    %0 = vector.load %arg0[%c0, %c0_0] : memref<32x64xf32, #tpu.memory_space<vmem>>, vector<32x64xf32>
    %c0_1 = arith.constant 0 : index
    %c0_2 = arith.constant 0 : index
    %1 = vector.load %arg2[%c0_1, %c0_2] : memref<64x16xf32, #tpu.memory_space<vmem>>, vector<64x16xf32>
    %cst = arith.constant dense<0.000000e+00> : vector<32x16xf32>
    %2 = tpu.matmul %0, %1, %cst {dimension_numbers = #tpu.dot_dimension_numbers<[1], [0], [0], [1], [0, 0, 1, 1], [], []>} : vector<32x64xf32>, vector<64x16xf32>, vector<32x16xf32> -> vector<32x16xf32>
    %c0_3 = arith.constant 0 : index
    %c0_4 = arith.constant 0 : index
    %3 = vector.load %arg3[%c0_3, %c0_4] : memref<1x16xf32, #tpu.memory_space<vmem>>, vector<1x16xf32>
    %4 = vector.broadcast %3 : vector<1x16xf32> to vector<32x16xf32>
    %5 = arith.addf %2, %4 : vector<32x16xf32>
    %c0_5 = arith.constant 0 : index
    %c0_6 = arith.constant 0 : index
    %6 = vector.load %arg1[%c0_5, %c0_6] : memref<1x64xf32, #tpu.memory_space<vmem>>, vector<1x64xf32>
    %c0_7 = arith.constant 0 : index
    %c0_8 = arith.constant 0 : index
    %7 = vector.load %arg4[%c0_7, %c0_8] : memref<64x8xf32, #tpu.memory_space<vmem>>, vector<64x8xf32>
    %cst_9 = arith.constant dense<0.000000e+00> : vector<1x8xf32>
    %8 = tpu.matmul %6, %7, %cst_9 {dimension_numbers = #tpu.dot_dimension_numbers<[1], [0], [0], [1], [0, 0, 1, 1], [], []>} : vector<1x64xf32>, vector<64x8xf32>, vector<1x8xf32> -> vector<1x8xf32>
    %c0_10 = arith.constant 0 : index
    %c0_11 = arith.constant 0 : index
    %9 = vector.load %arg5[%c0_10, %c0_11] : memref<1x8xf32, #tpu.memory_space<vmem>>, vector<1x8xf32>
    %10 = arith.addf %8, %9 : vector<1x8xf32>
    %c0_12 = arith.constant 0 : index
    %c0_13 = arith.constant 0 : index
    %11 = vector.load %arg6[%c0_12, %c0_13] : memref<8x16xf32, #tpu.memory_space<vmem>>, vector<8x16xf32>
    %cst_14 = arith.constant dense<0.000000e+00> : vector<1x16xf32>
    %12 = tpu.matmul %10, %11, %cst_14 {dimension_numbers = #tpu.dot_dimension_numbers<[1], [0], [0], [1], [0, 0, 1, 1], [], []>} : vector<1x8xf32>, vector<8x16xf32>, vector<1x16xf32> -> vector<1x16xf32>
    %c0_15 = arith.constant 0 : index
    %c0_16 = arith.constant 0 : index
    %13 = vector.load %arg7[%c0_15, %c0_16] : memref<1x16xf32, #tpu.memory_space<vmem>>, vector<1x16xf32>
    %14 = arith.addf %12, %13 : vector<1x16xf32>
    %15 = math.tanh %5 : vector<32x16xf32>
    %c0_17 = arith.constant 0 : index
    %c0_18 = arith.constant 0 : index
    %16 = vector.load %arg8[%c0_17, %c0_18] : memref<32x16xf32, #tpu.memory_space<vmem>>, vector<32x16xf32>
    %17 = arith.mulf %15, %16 : vector<32x16xf32>
    %c0_19 = arith.constant 0 : index
    %c0_20 = arith.constant 0 : index
    %18 = vector.load %arg9[%c0_19, %c0_20] : memref<32x16xf32, #tpu.memory_space<vmem>>, vector<32x16xf32>
    %19 = arith.addf %17, %18 : vector<32x16xf32>
    %20 = math.tanh %14 : vector<1x16xf32>
    %c0_21 = arith.constant 0 : index
    %c0_22 = arith.constant 0 : index
    %21 = vector.load %arg10[%c0_21, %c0_22] : memref<1x16xf32, #tpu.memory_space<vmem>>, vector<1x16xf32>
    %22 = arith.mulf %20, %21 : vector<1x16xf32>
    %c0_23 = arith.constant 0 : index
    %c0_24 = arith.constant 0 : index
    %23 = vector.load %arg11[%c0_23, %c0_24] : memref<1x16xf32, #tpu.memory_space<vmem>>, vector<1x16xf32>
    %24 = arith.addf %22, %23 : vector<1x16xf32>
    %c0_25 = arith.constant 0 : index
    %c0_26 = arith.constant 0 : index
    %25 = vector.load %arg12[%c0_25, %c0_26] : memref<16x64xf32, #tpu.memory_space<vmem>>, vector<16x64xf32>
    %c0_27 = arith.constant 0 : index
    %c0_28 = arith.constant 0 : index
    %26 = vector.load %arg13[%c0_27, %c0_28] : memref<64x32xf32, #tpu.memory_space<vmem>>, vector<64x32xf32>
    %cst_29 = arith.constant dense<0.000000e+00> : vector<16x32xf32>
    %27 = tpu.matmul %25, %26, %cst_29 {dimension_numbers = #tpu.dot_dimension_numbers<[1], [0], [0], [1], [0, 0, 1, 1], [], []>} : vector<16x64xf32>, vector<64x32xf32>, vector<16x32xf32> -> vector<16x32xf32>
    %c0_30 = arith.constant 0 : index
    %c0_31 = arith.constant 0 : index
    %28 = vector.load %arg14[%c0_30, %c0_31] : memref<16x1xf32, #tpu.memory_space<vmem>>, vector<16x1xf32>
    %29 = vector.broadcast %28 : vector<16x1xf32> to vector<16x32xf32>
    %30 = arith.addf %27, %29 : vector<16x32xf32>
    %c0_32 = arith.constant 0 : index
    %c0_33 = arith.constant 0 : index
    %31 = vector.load %arg15[%c0_32, %c0_33] : memref<1x32xf32, #tpu.memory_space<vmem>>, vector<1x32xf32>
    %c0_34 = arith.constant 0 : index
    %c0_35 = arith.constant 0 : index
    %32 = vector.load %arg16[%c0_34, %c0_35] : memref<32x8xf32, #tpu.memory_space<vmem>>, vector<32x8xf32>
    %cst_36 = arith.constant dense<0.000000e+00> : vector<1x8xf32>
    %33 = tpu.matmul %31, %32, %cst_36 {dimension_numbers = #tpu.dot_dimension_numbers<[1], [0], [0], [1], [0, 0, 1, 1], [], []>} : vector<1x32xf32>, vector<32x8xf32>, vector<1x8xf32> -> vector<1x8xf32>
    %c0_37 = arith.constant 0 : index
    %c0_38 = arith.constant 0 : index
    %34 = vector.load %arg17[%c0_37, %c0_38] : memref<1x8xf32, #tpu.memory_space<vmem>>, vector<1x8xf32>
    %35 = arith.addf %33, %34 : vector<1x8xf32>
    %c0_39 = arith.constant 0 : index
    %c0_40 = arith.constant 0 : index
    %36 = vector.load %arg18[%c0_39, %c0_40] : memref<8x32xf32, #tpu.memory_space<vmem>>, vector<8x32xf32>
    %cst_41 = arith.constant dense<0.000000e+00> : vector<1x32xf32>
    %37 = tpu.matmul %35, %36, %cst_41 {dimension_numbers = #tpu.dot_dimension_numbers<[1], [0], [0], [1], [0, 0, 1, 1], [], []>} : vector<1x8xf32>, vector<8x32xf32>, vector<1x32xf32> -> vector<1x32xf32>
    %c0_42 = arith.constant 0 : index
    %c0_43 = arith.constant 0 : index
    %38 = vector.load %arg19[%c0_42, %c0_43] : memref<1x32xf32, #tpu.memory_space<vmem>>, vector<1x32xf32>
    %39 = arith.addf %37, %38 : vector<1x32xf32>
    %40 = math.tanh %30 : vector<16x32xf32>
    %c0_44 = arith.constant 0 : index
    %c0_45 = arith.constant 0 : index
    %41 = vector.load %arg20[%c0_44, %c0_45] : memref<16x32xf32, #tpu.memory_space<vmem>>, vector<16x32xf32>
    %42 = arith.mulf %40, %41 : vector<16x32xf32>
    %c0_46 = arith.constant 0 : index
    %c0_47 = arith.constant 0 : index
    %43 = vector.load %arg21[%c0_46, %c0_47] : memref<16x32xf32, #tpu.memory_space<vmem>>, vector<16x32xf32>
    %44 = arith.addf %42, %43 : vector<16x32xf32>
    %45 = math.tanh %39 : vector<1x32xf32>
    %c0_48 = arith.constant 0 : index
    %c0_49 = arith.constant 0 : index
    %46 = vector.load %arg22[%c0_48, %c0_49] : memref<1x32xf32, #tpu.memory_space<vmem>>, vector<1x32xf32>
    %47 = arith.mulf %45, %46 : vector<1x32xf32>
    %c0_50 = arith.constant 0 : index
    %c0_51 = arith.constant 0 : index
    %48 = vector.load %arg23[%c0_50, %c0_51] : memref<1x32xf32, #tpu.memory_space<vmem>>, vector<1x32xf32>
    %49 = arith.addf %47, %48 : vector<1x32xf32>
    %50 = tpu.iota {dimensions = array<i32: 0>} : vector<128x32xi32>
    %51 = tpu.iota {dimensions = array<i32: 1>} : vector<128x32xi32>
    %52 = arith.cmpi eq, %50, %51 : vector<128x32xi32>
    %c32_i32 = arith.constant 32 : i32
    %53 = vector.broadcast %c32_i32 : i32 to vector<128x32xi32>
    %54 = arith.addi %51, %53 : vector<128x32xi32>
    %55 = arith.cmpi eq, %50, %54 : vector<128x32xi32>
    %56 = arith.ori %52, %55 : vector<128x32xi1>
    %c64_i32 = arith.constant 64 : i32
    %57 = vector.broadcast %c64_i32 : i32 to vector<128x32xi32>
    %58 = arith.addi %51, %57 : vector<128x32xi32>
    %59 = arith.cmpi eq, %50, %58 : vector<128x32xi32>
    %60 = arith.ori %56, %59 : vector<128x32xi1>
    %c96_i32 = arith.constant 96 : i32
    %61 = vector.broadcast %c96_i32 : i32 to vector<128x32xi32>
    %62 = arith.addi %51, %61 : vector<128x32xi32>
    %63 = arith.cmpi eq, %50, %62 : vector<128x32xi32>
    %64 = arith.ori %60, %63 : vector<128x32xi1>
    %65 = arith.extui %64 : vector<128x32xi1> to vector<128x32xi32>
    %66 = arith.sitofp %65 : vector<128x32xi32> to vector<128x32xf32>
    %67 = tpu.iota {dimensions = array<i32: 0>} : vector<64x16xi32>
    %68 = tpu.iota {dimensions = array<i32: 1>} : vector<64x16xi32>
    %69 = arith.cmpi eq, %67, %68 : vector<64x16xi32>
    %c16_i32 = arith.constant 16 : i32
    %70 = vector.broadcast %c16_i32 : i32 to vector<64x16xi32>
    %71 = arith.addi %68, %70 : vector<64x16xi32>
    %72 = arith.cmpi eq, %67, %71 : vector<64x16xi32>
    %73 = arith.ori %69, %72 : vector<64x16xi1>
    %c32_i32_52 = arith.constant 32 : i32
    %74 = vector.broadcast %c32_i32_52 : i32 to vector<64x16xi32>
    %75 = arith.addi %68, %74 : vector<64x16xi32>
    %76 = arith.cmpi eq, %67, %75 : vector<64x16xi32>
    %77 = arith.ori %73, %76 : vector<64x16xi1>
    %c48_i32 = arith.constant 48 : i32
    %78 = vector.broadcast %c48_i32 : i32 to vector<64x16xi32>
    %79 = arith.addi %68, %78 : vector<64x16xi32>
    %80 = arith.cmpi eq, %67, %79 : vector<64x16xi32>
    %81 = arith.ori %77, %80 : vector<64x16xi1>
    %82 = arith.extui %81 : vector<64x16xi1> to vector<64x16xi32>
    %83 = arith.sitofp %82 : vector<64x16xi32> to vector<64x16xf32>
    %84 = tpu.iota {dimensions = array<i32: 0>} : vector<32x128xi32>
    %85 = tpu.iota {dimensions = array<i32: 1>} : vector<32x128xi32>
    %86 = arith.cmpi eq, %85, %84 : vector<32x128xi32>
    %c32_i32_53 = arith.constant 32 : i32
    %87 = vector.broadcast %c32_i32_53 : i32 to vector<32x128xi32>
    %88 = arith.addi %84, %87 : vector<32x128xi32>
    %89 = arith.cmpi eq, %85, %88 : vector<32x128xi32>
    %90 = arith.ori %86, %89 : vector<32x128xi1>
    %c64_i32_54 = arith.constant 64 : i32
    %91 = vector.broadcast %c64_i32_54 : i32 to vector<32x128xi32>
    %92 = arith.addi %84, %91 : vector<32x128xi32>
    %93 = arith.cmpi eq, %85, %92 : vector<32x128xi32>
    %94 = arith.ori %90, %93 : vector<32x128xi1>
    %c96_i32_55 = arith.constant 96 : i32
    %95 = vector.broadcast %c96_i32_55 : i32 to vector<32x128xi32>
    %96 = arith.addi %84, %95 : vector<32x128xi32>
    %97 = arith.cmpi eq, %85, %96 : vector<32x128xi32>
    %98 = arith.ori %94, %97 : vector<32x128xi1>
    %99 = arith.extui %98 : vector<32x128xi1> to vector<32x128xi32>
    %100 = arith.sitofp %99 : vector<32x128xi32> to vector<32x128xf32>
    %101 = tpu.iota {dimensions = array<i32: 0>} : vector<16x64xi32>
    %102 = tpu.iota {dimensions = array<i32: 1>} : vector<16x64xi32>
    %103 = arith.cmpi eq, %102, %101 : vector<16x64xi32>
    %c16_i32_56 = arith.constant 16 : i32
    %104 = vector.broadcast %c16_i32_56 : i32 to vector<16x64xi32>
    %105 = arith.addi %101, %104 : vector<16x64xi32>
    %106 = arith.cmpi eq, %102, %105 : vector<16x64xi32>
    %107 = arith.ori %103, %106 : vector<16x64xi1>
    %c32_i32_57 = arith.constant 32 : i32
    %108 = vector.broadcast %c32_i32_57 : i32 to vector<16x64xi32>
    %109 = arith.addi %101, %108 : vector<16x64xi32>
    %110 = arith.cmpi eq, %102, %109 : vector<16x64xi32>
    %111 = arith.ori %107, %110 : vector<16x64xi1>
    %c48_i32_58 = arith.constant 48 : i32
    %112 = vector.broadcast %c48_i32_58 : i32 to vector<16x64xi32>
    %113 = arith.addi %101, %112 : vector<16x64xi32>
    %114 = arith.cmpi eq, %102, %113 : vector<16x64xi32>
    %115 = arith.ori %111, %114 : vector<16x64xi1>
    %116 = arith.extui %115 : vector<16x64xi1> to vector<16x64xi32>
    %117 = arith.sitofp %116 : vector<16x64xi32> to vector<16x64xf32>
    %cst_59 = arith.constant dense<0.000000e+00> : vector<128x16xf32>
    %118 = tpu.matmul %66, %19, %cst_59 {dimension_numbers = #tpu.dot_dimension_numbers<[1], [0], [0], [1], [0, 0, 1, 1], [], []>} : vector<128x32xf32>, vector<32x16xf32>, vector<128x16xf32> -> vector<128x16xf32>
    %cst_60 = arith.constant dense<0.000000e+00> : vector<128x64xf32>
    %119 = tpu.matmul %118, %117, %cst_60 {dimension_numbers = #tpu.dot_dimension_numbers<[1], [0], [0], [1], [0, 0, 1, 1], [], []>} : vector<128x16xf32>, vector<16x64xf32>, vector<128x64xf32> -> vector<128x64xf32>
    %120 = tpu.iota {dimensions = array<i32: 0>} : vector<128x64xi32>
    %121 = tpu.iota {dimensions = array<i32: 1>} : vector<128x64xi32>
    %c0_i32 = arith.constant 0 : i32
    %122 = vector.broadcast %c0_i32 : i32 to vector<128x64xi32>
    %123 = arith.cmpi sge, %120, %122 : vector<128x64xi32>
    %c32_i32_61 = arith.constant 32 : i32
    %124 = vector.broadcast %c32_i32_61 : i32 to vector<128x64xi32>
    %125 = arith.cmpi slt, %120, %124 : vector<128x64xi32>
    %126 = arith.andi %123, %125 : vector<128x64xi1>
    %c0_i32_62 = arith.constant 0 : i32
    %127 = vector.broadcast %c0_i32_62 : i32 to vector<128x64xi32>
    %128 = arith.cmpi sge, %121, %127 : vector<128x64xi32>
    %129 = arith.andi %126, %128 : vector<128x64xi1>
    %c16_i32_63 = arith.constant 16 : i32
    %130 = vector.broadcast %c16_i32_63 : i32 to vector<128x64xi32>
    %131 = arith.cmpi slt, %121, %130 : vector<128x64xi32>
    %132 = arith.andi %129, %131 : vector<128x64xi1>
    %c32_i32_64 = arith.constant 32 : i32
    %133 = vector.broadcast %c32_i32_64 : i32 to vector<128x64xi32>
    %134 = arith.cmpi sge, %120, %133 : vector<128x64xi32>
    %c64_i32_65 = arith.constant 64 : i32
    %135 = vector.broadcast %c64_i32_65 : i32 to vector<128x64xi32>
    %136 = arith.cmpi slt, %120, %135 : vector<128x64xi32>
    %137 = arith.andi %134, %136 : vector<128x64xi1>
    %c16_i32_66 = arith.constant 16 : i32
    %138 = vector.broadcast %c16_i32_66 : i32 to vector<128x64xi32>
    %139 = arith.cmpi sge, %121, %138 : vector<128x64xi32>
    %140 = arith.andi %137, %139 : vector<128x64xi1>
    %c32_i32_67 = arith.constant 32 : i32
    %141 = vector.broadcast %c32_i32_67 : i32 to vector<128x64xi32>
    %142 = arith.cmpi slt, %121, %141 : vector<128x64xi32>
    %143 = arith.andi %140, %142 : vector<128x64xi1>
    %144 = arith.ori %132, %143 : vector<128x64xi1>
    %c64_i32_68 = arith.constant 64 : i32
    %145 = vector.broadcast %c64_i32_68 : i32 to vector<128x64xi32>
    %146 = arith.cmpi sge, %120, %145 : vector<128x64xi32>
    %c96_i32_69 = arith.constant 96 : i32
    %147 = vector.broadcast %c96_i32_69 : i32 to vector<128x64xi32>
    %148 = arith.cmpi slt, %120, %147 : vector<128x64xi32>
    %149 = arith.andi %146, %148 : vector<128x64xi1>
    %c32_i32_70 = arith.constant 32 : i32
    %150 = vector.broadcast %c32_i32_70 : i32 to vector<128x64xi32>
    %151 = arith.cmpi sge, %121, %150 : vector<128x64xi32>
    %152 = arith.andi %149, %151 : vector<128x64xi1>
    %c48_i32_71 = arith.constant 48 : i32
    %153 = vector.broadcast %c48_i32_71 : i32 to vector<128x64xi32>
    %154 = arith.cmpi slt, %121, %153 : vector<128x64xi32>
    %155 = arith.andi %152, %154 : vector<128x64xi1>
    %156 = arith.ori %144, %155 : vector<128x64xi1>
    %c96_i32_72 = arith.constant 96 : i32
    %157 = vector.broadcast %c96_i32_72 : i32 to vector<128x64xi32>
    %158 = arith.cmpi sge, %120, %157 : vector<128x64xi32>
    %c128_i32 = arith.constant 128 : i32
    %159 = vector.broadcast %c128_i32 : i32 to vector<128x64xi32>
    %160 = arith.cmpi slt, %120, %159 : vector<128x64xi32>
    %161 = arith.andi %158, %160 : vector<128x64xi1>
    %c48_i32_73 = arith.constant 48 : i32
    %162 = vector.broadcast %c48_i32_73 : i32 to vector<128x64xi32>
    %163 = arith.cmpi sge, %121, %162 : vector<128x64xi32>
    %164 = arith.andi %161, %163 : vector<128x64xi1>
    %c64_i32_74 = arith.constant 64 : i32
    %165 = vector.broadcast %c64_i32_74 : i32 to vector<128x64xi32>
    %166 = arith.cmpi slt, %121, %165 : vector<128x64xi32>
    %167 = arith.andi %164, %166 : vector<128x64xi1>
    %168 = arith.ori %156, %167 : vector<128x64xi1>
    %cst_75 = arith.constant 0.000000e+00 : f32
    %169 = vector.broadcast %cst_75 : f32 to vector<128x64xf32>
    %170 = arith.select %168, %119, %169 : vector<128x64xi1>, vector<128x64xf32>
    %c0_76 = arith.constant 0 : index
    %c0_77 = arith.constant 0 : index
    %171 = vector.load %arg24[%c0_76, %c0_77] : memref<128x64xf32, #tpu.memory_space<vmem>>, vector<128x64xf32>
    tpu.vector_store %arg24[%c0_76, %c0_77], %170 {strides = array<i32>} : memref<128x64xf32, #tpu.memory_space<vmem>>, vector<128x64xf32>,
    %cst_78 = arith.constant dense<0.000000e+00> : vector<1x64xf32>
    %172 = tpu.matmul %24, %117, %cst_78 {dimension_numbers = #tpu.dot_dimension_numbers<[1], [0], [0], [1], [0, 0, 1, 1], [], []>} : vector<1x16xf32>, vector<16x64xf32>, vector<1x64xf32> -> vector<1x64xf32>
    %c0_79 = arith.constant 0 : index
    %c0_80 = arith.constant 0 : index
    %173 = vector.load %arg25[%c0_79, %c0_80] : memref<1x64xf32, #tpu.memory_space<vmem>>, vector<1x64xf32>
    tpu.vector_store %arg25[%c0_79, %c0_80], %172 {strides = array<i32>} : memref<1x64xf32, #tpu.memory_space<vmem>>, vector<1x64xf32>,
    %cst_81 = arith.constant dense<0.000000e+00> : vector<64x32xf32>
    %174 = tpu.matmul %83, %44, %cst_81 {dimension_numbers = #tpu.dot_dimension_numbers<[1], [0], [0], [1], [0, 0, 1, 1], [], []>} : vector<64x16xf32>, vector<16x32xf32>, vector<64x32xf32> -> vector<64x32xf32>
    %cst_82 = arith.constant dense<0.000000e+00> : vector<64x128xf32>
    %175 = tpu.matmul %174, %100, %cst_82 {dimension_numbers = #tpu.dot_dimension_numbers<[1], [0], [0], [1], [0, 0, 1, 1], [], []>} : vector<64x32xf32>, vector<32x128xf32>, vector<64x128xf32> -> vector<64x128xf32>
    %176 = tpu.iota {dimensions = array<i32: 0>} : vector<64x128xi32>
    %177 = tpu.iota {dimensions = array<i32: 1>} : vector<64x128xi32>
    %c0_i32_83 = arith.constant 0 : i32
    %178 = vector.broadcast %c0_i32_83 : i32 to vector<64x128xi32>
    %179 = arith.cmpi sge, %176, %178 : vector<64x128xi32>
    %c16_i32_84 = arith.constant 16 : i32
    %180 = vector.broadcast %c16_i32_84 : i32 to vector<64x128xi32>
    %181 = arith.cmpi slt, %176, %180 : vector<64x128xi32>
    %182 = arith.andi %179, %181 : vector<64x128xi1>
    %c0_i32_85 = arith.constant 0 : i32
    %183 = vector.broadcast %c0_i32_85 : i32 to vector<64x128xi32>
    %184 = arith.cmpi sge, %177, %183 : vector<64x128xi32>
    %185 = arith.andi %182, %184 : vector<64x128xi1>
    %c32_i32_86 = arith.constant 32 : i32
    %186 = vector.broadcast %c32_i32_86 : i32 to vector<64x128xi32>
    %187 = arith.cmpi slt, %177, %186 : vector<64x128xi32>
    %188 = arith.andi %185, %187 : vector<64x128xi1>
    %c16_i32_87 = arith.constant 16 : i32
    %189 = vector.broadcast %c16_i32_87 : i32 to vector<64x128xi32>
    %190 = arith.cmpi sge, %176, %189 : vector<64x128xi32>
    %c32_i32_88 = arith.constant 32 : i32
    %191 = vector.broadcast %c32_i32_88 : i32 to vector<64x128xi32>
    %192 = arith.cmpi slt, %176, %191 : vector<64x128xi32>
    %193 = arith.andi %190, %192 : vector<64x128xi1>
    %c32_i32_89 = arith.constant 32 : i32
    %194 = vector.broadcast %c32_i32_89 : i32 to vector<64x128xi32>
    %195 = arith.cmpi sge, %177, %194 : vector<64x128xi32>
    %196 = arith.andi %193, %195 : vector<64x128xi1>
    %c64_i32_90 = arith.constant 64 : i32
    %197 = vector.broadcast %c64_i32_90 : i32 to vector<64x128xi32>
    %198 = arith.cmpi slt, %177, %197 : vector<64x128xi32>
    %199 = arith.andi %196, %198 : vector<64x128xi1>
    %200 = arith.ori %188, %199 : vector<64x128xi1>
    %c32_i32_91 = arith.constant 32 : i32
    %201 = vector.broadcast %c32_i32_91 : i32 to vector<64x128xi32>
    %202 = arith.cmpi sge, %176, %201 : vector<64x128xi32>
    %c48_i32_92 = arith.constant 48 : i32
    %203 = vector.broadcast %c48_i32_92 : i32 to vector<64x128xi32>
    %204 = arith.cmpi slt, %176, %203 : vector<64x128xi32>
    %205 = arith.andi %202, %204 : vector<64x128xi1>
    %c64_i32_93 = arith.constant 64 : i32
    %206 = vector.broadcast %c64_i32_93 : i32 to vector<64x128xi32>
    %207 = arith.cmpi sge, %177, %206 : vector<64x128xi32>
    %208 = arith.andi %205, %207 : vector<64x128xi1>
    %c96_i32_94 = arith.constant 96 : i32
    %209 = vector.broadcast %c96_i32_94 : i32 to vector<64x128xi32>
    %210 = arith.cmpi slt, %177, %209 : vector<64x128xi32>
    %211 = arith.andi %208, %210 : vector<64x128xi1>
    %212 = arith.ori %200, %211 : vector<64x128xi1>
    %c48_i32_95 = arith.constant 48 : i32
    %213 = vector.broadcast %c48_i32_95 : i32 to vector<64x128xi32>
    %214 = arith.cmpi sge, %176, %213 : vector<64x128xi32>
    %c64_i32_96 = arith.constant 64 : i32
    %215 = vector.broadcast %c64_i32_96 : i32 to vector<64x128xi32>
    %216 = arith.cmpi slt, %176, %215 : vector<64x128xi32>
    %217 = arith.andi %214, %216 : vector<64x128xi1>
    %c96_i32_97 = arith.constant 96 : i32
    %218 = vector.broadcast %c96_i32_97 : i32 to vector<64x128xi32>
    %219 = arith.cmpi sge, %177, %218 : vector<64x128xi32>
    %220 = arith.andi %217, %219 : vector<64x128xi1>
    %c128_i32_98 = arith.constant 128 : i32
    %221 = vector.broadcast %c128_i32_98 : i32 to vector<64x128xi32>
    %222 = arith.cmpi slt, %177, %221 : vector<64x128xi32>
    %223 = arith.andi %220, %222 : vector<64x128xi1>
    %224 = arith.ori %212, %223 : vector<64x128xi1>
    %cst_99 = arith.constant 0.000000e+00 : f32
    %225 = vector.broadcast %cst_99 : f32 to vector<64x128xf32>
    %226 = arith.select %224, %175, %225 : vector<64x128xi1>, vector<64x128xf32>
    %c0_100 = arith.constant 0 : index
    %c0_101 = arith.constant 0 : index
    %227 = vector.load %arg26[%c0_100, %c0_101] : memref<64x128xf32, #tpu.memory_space<vmem>>, vector<64x128xf32>
    tpu.vector_store %arg26[%c0_100, %c0_101], %226 {strides = array<i32>} : memref<64x128xf32, #tpu.memory_space<vmem>>, vector<64x128xf32>,
    %cst_102 = arith.constant dense<0.000000e+00> : vector<1x128xf32>
    %228 = tpu.matmul %49, %100, %cst_102 {dimension_numbers = #tpu.dot_dimension_numbers<[1], [0], [0], [1], [0, 0, 1, 1], [], []>} : vector<1x32xf32>, vector<32x128xf32>, vector<1x128xf32> -> vector<1x128xf32>
    %c0_103 = arith.constant 0 : index
    %c0_104 = arith.constant 0 : index
    %229 = vector.load %arg27[%c0_103, %c0_104] : memref<1x128xf32, #tpu.memory_space<vmem>>, vector<1x128xf32>
    tpu.vector_store %arg27[%c0_103, %c0_104], %228 {strides = array<i32>} : memref<1x128xf32, #tpu.memory_space<vmem>>, vector<1x128xf32>,
    return
  }
}

</mosaic_0001>

<bundles_post_ra>
// kernel: parameter_generator_adapter_forward.3
= control target key start
LH: loop header
LB: loop body
LE: loop exit
PB: predicated region body
PF: predicated region fallthrough
CT: control target
= control target key end

     0   :  { %vm74_vm0 = vcmask 523264   ;;  %s220_s1 = inlined_call_operand.vmem [shape: f32[128,64], index: 1, kind: input, shape index: {}]   ;;  %s221_s3 = inlined_call_operand.vmem [shape: f32[64,128], index: 3, kind: input, shape index: {}]   ;;  %s222_s2 = inlined_call_operand.vmem [shape: f32[1,64], index: 2, kind: input, shape index: {}]   ;;  %s223_s0 = inlined_call_operand.vmem [shape: f32[4,128], index: 0, kind: input, shape index: {}]   ;;  %s224_s4 = inlined_call_operand.vmem [shape: f32[1,128], index: 4, kind: input, shape index: {}]   ;;  %s225_s5 = inlined_call_operand.vmem [shape: f32[4,128], index: 5, kind: output, shape index: {}]  }
   0x1   :  { %v36_v0 = vld [vmem:[%s220_s1 + $0x78] sm:$0xff]  ;;  %v35_v1 = vld [vmem:[%s220_s1 + $0x70] sm:$0xff]  ;;  %v34_v2 = vld [vmem:[%s220_s1 + $0x68] sm:$0xff] }
   0x2   :  { %41 = vmatpush.msra.mxu0 %v36_v0  ;;  %v33_v3 = vld [vmem:[%s220_s1 + $0x60] sm:$0xff]  ;;  %v69_v4 = vld [vmem:[%s221_s3 + $0x38] sm:$0xff]  ;;  %v68_v6 = vld [vmem:[%s221_s3 + $0x30] sm:$0xff] }
   0x3   :  { %v32_v5 = vld [vmem:[%s220_s1 + $0x58] sm:$0xff]  ;;  %86 = vmatpush.msra.mxu1 %v69_v4  ;;  %v67_v7 = vld [vmem:[%s221_s3 + $0x28] sm:$0xff]  ;;  %v31_v8 = vld [vmem:[%s220_s1 + $0x50] sm:$0xff] }
   0x4   :  { %42 = vmatpush.msra.mxu0 %v35_v1  ;;  %v66_v9 = vld [vmem:[%s221_s3 + $0x20] sm:$0xff]  ;;  %v30_v10 = vld [vmem:[%s220_s1 + $0x48] sm:$0xff]  ;;  %v65_v11 = vld [vmem:[%s221_s3 + $0x18] sm:$0xff] }
   0x5   :  { %87 = vmatpush.msra.mxu1 %v68_v6  ;;  %v29_v12 = vld [vmem:[%s220_s1 + $0x40] sm:$0xff]  ;;  %v28_v13 = vld [vmem:[%s220_s1 + $0x38] sm:$0xff]  ;;  %v27_v14 = vld [vmem:[%s220_s1 + $0x30] sm:$0xff] }
   0x6   :  { %43 = vmatpush.msra.mxu0 %v34_v2  ;;  %v26_v15 = vld [vmem:[%s220_s1 + $0x28] sm:$0xff]  ;;  %v25_v16 = vld [vmem:[%s220_s1 + $0x20] sm:$0xff]  ;;  %v24_v17 = vld [vmem:[%s220_s1 + $0x18] sm:$0xff] }
   0x7   :  { %88 = vmatpush.msra.mxu1 %v67_v7  ;;  %v23_v18 = vld [vmem:[%s220_s1 + $0x10] sm:$0xff]  ;;  %v22_v19 = vld [vmem:[%s220_s1 + $0x8] sm:$0xff]  ;;  %v21_v20 = vld [vmem:[%s220_s1] sm:$0xff] }
   0x8   :  { %44 = vmatpush.msra.mxu0 %v33_v3  ;;  %v20_v21 = vld [vmem:[%s223_s0] sm:$0xf]  ;;  %v64_v22 = vld [vmem:[%s221_s3 + $0x10] sm:$0xff]  ;;  %v63_v23 = vld [vmem:[%s221_s3 + $0x8] sm:$0xff] }
   0x9   :  { %89 = vmatpush.msra.mxu1 %v66_v9  ;;  %v62_v24 = vld [vmem:[%s221_s3] sm:$0xff] }
   0xa   :  { %45 = vmatpush.msra.mxu0 %v32_v5  ;;  %v104_v25 = vld [vmem:[%s222_s2] ss:$0 sm:$0xff] }
   0xb   :  { %90 = vmatpush.msra.mxu1 %v65_v11  ;;  %v105_v29 = vld [vmem:[%s224_s4] ss:$0 sm:$0xff] }
   0xc   :  { %46 = vmatpush.msra.mxu0 %v31_v8 }
   0xd   :  { %91 = vmatpush.msra.mxu1 %v64_v22 }
   0xe   :  { %47 = vmatpush.msra.mxu0 %v30_v10 }
   0xf   :  { %92 = vmatpush.msra.mxu1 %v63_v23 }
  0x10   :  { %48 = vmatpush.msra.mxu0 %v29_v12 }
  0x11   :  { %93 = vmatpush.msra.mxu1 %v62_v24 }
  0x12   :  { %49 = vmatpush.msra.mxu0 %v28_v13 }
  0x14   :  { %50 = vmatpush.msra.mxu0 %v27_v14 }
  0x16   :  { %51 = vmatpush.msra.mxu0 %v26_v15 }
  0x18   :  { %52 = vmatpush.msra.mxu0 %v25_v16 }
  0x1a   :  { %53 = vmatpush.msra.mxu0 %v24_v17 }
  0x1c   :  { %54 = vmatpush.msra.mxu0 %v23_v18 }
  0x1e   :  { %55 = vmatpush.msra.mxu0 %v22_v19 }
  0x20   :  { %56 = vmatpush.msra.mxu0 %v21_v20 }
  0x21   :  { %57 = vmatmul.f32.vlgmr.msra.gmra.mxu0 %v20_v21 }
  0x9e   :  { %v58_v26 = vpop.f32.mrf.mxu0 }
  0x9f   :  { %v59_v27 = vadd.f32 %v104_v25, %v58_v26 }
  0xa1   :  { %v61_v28 = vmax.f32 %v59_v27, 0.0 }
  0xa3   :  { %103 = vmatmul.msk.f32.vlgmr.msra.gmra.mxu1 %vm74_vm0, %v61_v28 }
 0x120   :  { %v95_v30 = vpop.f32.mrf.mxu1 }
 0x121   :  { %v96_v31 = vadd.f32 %v105_v29, %v95_v30 }
 0x123   :  { %98 = vst [vmem:[%s225_s5] sm:$0xf] %v96_v31 }

// kernel: parameter_generator_adapter_forward.2
= control target key start
LH: loop header
LB: loop body
LE: loop exit
PB: predicated region body
PF: predicated region fallthrough
CT: control target
= control target key end

     0   :  { %v1755_v14 = vmov 0   ;;  %vm2636_vm0 = vcmask 523264   ;;  %vm174_vm1 = vcmask 64512   ;;  %vm2650_vm2 = vcmask 261120   ;;  %s2601_s4 = inlined_call_operand.vmem [shape: f32[64,8], index: 4, kind: input, shape index: {}]   ;;  %s2602_s2 = inlined_call_operand.vmem [shape: f32[64,16], index: 2, kind: input, shape index: {}]   ;;  %s2603_s1 = inlined_call_operand.vmem [shape: f32[1,64], index: 1, kind: input, shape index: {}]   ;;  %s2604_s13 = inlined_call_operand.vmem [shape: f32[64,32], index: 13, kind: input, shape index: {}]   ;;  %s2605_s14 = inlined_call_operand.vmem [shape: f32[16,1], index: 14, kind: input, shape index: {}]   ;;  %s2606_s0 = inlined_call_operand.vmem [shape: f32[32,64], index: 0, kind: input, shape index: {}]   ;;  %s2607_s6 = inlined_call_operand.vmem [shape: f32[8,16], index: 6, kind: input, shape index: {}]   ;;  %s2608_s3 = inlined_call_operand.vmem [shape: f32[1,16], index: 3, kind: input, shape index: {}]   ;;  %s2609_s12 = inlined_call_operand.vmem [shape: f32[16,64], index: 12, kind: input, shape index: {}]   ;;  %s2610_s16 = inlined_call_operand.vmem [shape: f32[32,8], index: 16, kind: input, shape index: {}]   ;;  %s2611_s5 = inlined_call_operand.vmem [shape: f32[1,8], index: 5, kind: input, shape index: {}]   ;;  %s2612_s15 = inlined_call_operand.vmem [shape: f32[1,32], index: 15, kind: input, shape index: {}]   ;;  %s2613_s8 = inlined_call_operand.vmem [shape: f32[32,16], index: 8, kind: input, shape index: {}]   ;;  %s2614_s9 = inlined_call_operand.vmem [shape: f32[32,16], index: 9, kind: input, shape index: {}]   ;;  %s2615_s20 = inlined_call_operand.vmem [shape: f32[16,32], index: 20, kind: input, shape index: {}]   ;;  %s2616_s21 = inlined_call_operand.vmem [shape: f32[16,32], index: 21, kind: input, shape index: {}]   ;;  %s2617_s7 = inlined_call_operand.vmem [shape: f32[1,16], index: 7, kind: input, shape index: {}]   ;;  %s2618_s10 = inlined_call_operand.vmem [shape: f32[1,16], index: 10, kind: input, shape index: {}]   ;;  %s2619_s11 = inlined_call_operand.vmem [shape: f32[1,16], index: 11, kind: input, shape index: {}]   ;;  %s2620_s18 = inlined_call_operand.vmem [shape: f32[8,32], index: 18, kind: input, shape index: {}]   ;;  %s2621_s17 = inlined_call_operand.vmem [shape: f32[1,8], index: 17, kind: input, shape index: {}]   ;;  %s2622_s25 = inlined_call_operand.vmem [shape: f32[1,64], index: 25, kind: output, shape index: {1}]   ;;  %s2623_s19 = inlined_call_operand.vmem [shape: f32[1,32], index: 19, kind: input, shape index: {}]   ;;  %s2624_s22 = inlined_call_operand.vmem [shape: f32[1,32], index: 22, kind: input, shape index: {}]   ;;  %s2625_s23 = inlined_call_operand.vmem [shape: f32[1,32], index: 23, kind: input, shape index: {}]   ;;  %s2626_s24 = inlined_call_operand.vmem [shape: f32[128,64], index: 24, kind: output, shape index: {0}]   ;;  %s2627_s26 = inlined_call_operand.vmem [shape: f32[64,128], index: 26, kind: output, shape index: {2}]   ;;  %s2628_s27 = inlined_call_operand.vmem [shape: f32[1,128], index: 27, kind: output, shape index: {3}]  }
   0x1   :  { %2652 = sst [smem:[#allocation2_spill]] %s2601_s4  ;;  %1737 = vset.pattern.permute.xlu0 %v1755_v14  ;;  %v204_v53 = vld [vmem:[%s2613_s8 + $0x10] sm:$0xff]  ;;  %v205_v55 = vld [vmem:[%s2613_s8 + $0x18] sm:$0xff]  ;;  %v203_v56 = vld [vmem:[%s2613_s8 + $0x8] sm:$0xff]  ;;  %v344_v57 = vlaneseq }
   0x2   :  { %2653 = sst [smem:[#allocation3_spill]] %s2602_s2  ;;  %v213_v61 = vld [vmem:[%s2614_s9 + $0x18] sm:$0xff]  ;;  %v212_v62 = vld [vmem:[%s2614_s9 + $0x10] sm:$0xff]  ;;  %v202_v63 = vld [vmem:[%s2613_s8] sm:$0xff] }
   0x3   :  { %2654 = sst [smem:[#allocation4_spill]] %s2603_s1 }
   0x4   :  { %2655 = sst [smem:[#allocation5_spill]] %s2604_s13 }
   0x5   :  { %2656 = sst [smem:[#allocation6_spill]] %s2605_s14 }
   0x6   :  { %2657 = sst [smem:[#allocation7_spill]] %s2606_s0 }
   0x7   :  { %2658 = sst [smem:[#allocation8_spill]] %s2607_s6 }
   0x8   :  { %2659 = sst [smem:[#allocation9_spill]] %s2608_s3 }
   0x9   :  { %2660 = sst [smem:[#allocation10_spill]] %s2609_s12 }
   0xa   :  { %2661 = sst [smem:[#allocation11_spill]] %s2610_s16 }
   0xb   :  { %2662 = sst [smem:[#allocation12_spill]] %s2611_s5 }
   0xc   :  { %2663 = sst [smem:[#allocation13_spill]] %s2612_s15 }
   0xd   :  { %s2664_s14 = sld [smem:[#allocation2_spill]] }
   0xe   :  { %s2665_s29 = sld [smem:[#allocation3_spill]] }
   0xf   :  { %s2666_s0 = sld [smem:[#allocation4_spill]] }
  0x10   :  { %s2667_s6 = sld [smem:[#allocation5_spill]] }
  0x11   :  { %s2668_s3 = sld [smem:[#allocation6_spill]] }
  0x12   :  { %s2669_s16 = sld [smem:[#allocation7_spill]] }
  0x13   :  { %v147_v0 = vld [vmem:[%s2664_s14 + $0x38] sm:$0xff]  ;;  %v146_v1 = vld [vmem:[%s2664_s14 + $0x30] sm:$0xff]  ;;  %v145_v2 = vld [vmem:[%s2664_s14 + $0x28] sm:$0xff]  ;;  %s2670_s4 = sld [smem:[#allocation8_spill]] }
  0x14   :  { %160 = vmatpush.msra.mxu3 %v147_v0  ;;  %v92_v3 = vld [vmem:[%s2665_s29 + $0x38] sm:$0xff]  ;;  %v91_v4 = vld [vmem:[%s2665_s29 + $0x30] sm:$0xff]  ;;  %v144_v5 = vld [vmem:[%s2664_s14 + $0x20] sm:$0xff]  ;;  %s2671_s12 = sld [smem:[#allocation10_spill]] }
  0x15   :  { %118 = vmatpush.msra.mxu0 %v92_v3  ;;  %v90_v6 = vld [vmem:[%s2665_s29 + $0x28] sm:$0xff]  ;;  %v143_v7 = vld [vmem:[%s2664_s14 + $0x18] sm:$0xff]  ;;  %v89_v8 = vld [vmem:[%s2665_s29 + $0x20] sm:$0xff]  ;;  %s2673_s30 = sld [smem:[#allocation12_spill]]  ;;  %v2051_v3 = vshrl.u32 %v344_v57, 7 }
  0x16   :  { %161 = vmatpush.msra.mxu3 %v146_v1  ;;  %v142_v9 = vld [vmem:[%s2664_s14 + $0x10] sm:$0xff]  ;;  %v88_v10 = vld [vmem:[%s2665_s29 + $0x18] sm:$0xff]  ;;  %v141_v11 = vld [vmem:[%s2664_s14 + $0x8] sm:$0xff]  ;;  %s2675_s1 = sld [smem:[#allocation9_spill]] }
  0x17   :  { %119 = vmatpush.msra.mxu0 %v91_v4  ;;  %v87_v12 = vld [vmem:[%s2665_s29 + $0x10] sm:$0xff]  ;;  %v140_v13 = vld [vmem:[%s2664_s14] sm:$0xff]  ;;  %v86_v16 = vld [vmem:[%s2665_s29 + $0x8] sm:$0xff]  ;;  %s2672_s14 = sld [smem:[#allocation11_spill]]  ;;  %v2053_v4 = vand.u32 127, %v344_v57 }
  0x18   :  { %162 = vmatpush.msra.mxu3 %v145_v2  ;;  %v139_v15 = vld [vmem:[%s2666_s0] sm:$0x1]  ;;  %v232_v17 = vld [vmem:[%s2667_s6 + $0x38] sm:$0xff]  ;;  %v234_v18 = vld [vmem:[%s2668_s3 + $0x8] sm:$0xff] }
  0x19   :  { %120 = vmatpush.msra.mxu0 %v90_v6  ;;  %v85_v19 = vld [vmem:[%s2665_s29] sm:$0xff]  ;;  %242 = vperm.xlu0 %1737, %v234_v18   ;;  %v231_v21 = vld [vmem:[%s2667_s6 + $0x30] sm:$0xff]  ;;  %v230_v23 = vld [vmem:[%s2667_s6 + $0x28] sm:$0xff]  ;;  %vm363_vm3 = vcmp.eq.s32.totalorder %v2051_v3, %v2053_v4 }
  0x1a   :  { %163 = vmatpush.msra.mxu3 %v144_v5  ;;  %v81_v20 = vld [vmem:[%s2669_s16] sm:$0xff]  ;;  %v228_v25 = vld [vmem:[%s2667_s6 + $0x18] sm:$0xff]  ;;  %v82_v26 = vld [vmem:[%s2669_s16 + $0x8] sm:$0xff] }
  0x1b   :  { %121 = vmatpush.msra.mxu0 %v89_v8  ;;  %v172_v22 = vld [vmem:[%s2670_s4] sm:$0xff]  ;;  %v227_v27 = vld [vmem:[%s2667_s6 + $0x10] sm:$0xff]  ;;  %v226_v28 = vld [vmem:[%s2667_s6 + $0x8] sm:$0xff]  ;;  %s2674_s4 = sld [smem:[#allocation13_spill]] }
  0x1c   :  { %164 = vmatpush.msra.mxu3 %v143_v7  ;;  %v229_v24 = vld [vmem:[%s2667_s6 + $0x20] sm:$0xff]  ;;  %v83_v31 = vld [vmem:[%s2669_s16 + $0x10] sm:$0xff]  ;;  %v224_v32 = vld [vmem:[%s2671_s12 + $0x8] sm:$0xff] }
  0x1d   :  { %122 = vmatpush.msra.mxu0 %v88_v10  ;;  %v225_v29 = vld [vmem:[%s2667_s6] sm:$0xff]  ;;  %v84_v33 = vld [vmem:[%s2669_s16 + $0x18] sm:$0xff]  ;;  %v277_v36 = vld [vmem:[%s2672_s14 + $0x10] sm:$0xff] }
  0x1e   :  { %165 = vmatpush.msra.mxu3 %v142_v9  ;;  %v223_v30 = vld [vmem:[%s2671_s12] sm:$0xff]  ;;  %v278_v35 = vld [vmem:[%s2672_s14 + $0x18] sm:$0xff]  ;;  %v276_v41 = vld [vmem:[%s2672_s14 + $0x8] sm:$0xff] }
  0x1f   :  { %123 = vmatpush.msra.mxu0 %v87_v12  ;;  %v233_v34 = vld [vmem:[%s2668_s3] sm:$0xff]  ;;  %296 = vmatpush.msra.mxu2 %v278_v35  ;;  %v211_v2 = vld [vmem:[%s2614_s9 + $0x8] sm:$0xff] }
  0x20   :  { %166 = vmatpush.msra.mxu3 %v141_v11  ;;  %v148_v38 = vld [vmem:[%s2673_s30] sm:$0x1]  ;;  %v1756_v11 = vmov 0.0  }
  0x21   :  { %124 = vmatpush.msra.mxu0 %v86_v16  ;;  %237 = vperm.xlu0 %1737, %v233_v34   ;;  %v275_v43 = vld [vmem:[%s2672_s14] sm:$0xff]  ;;  %v2061_v12 = vsel %vm363_vm3, 1.0, %v1756_v11 }
  0x22   :  { %167 = vmatpush.msra.mxu3 %v140_v13  ;;  %297 = vmatpush.msra.mxu2 %v277_v36  ;;  %v274_v44 = vld [vmem:[%s2674_s4] sm:$0x1]  ;;  %v2064_v13 = vadd.s32 8, %v2051_v3  ;;  %v332_v36 = vld [vmem:[%s2615_s20 + $0x8] sm:$0xff] }
  0x23   :  { %1634 = vmatmul.msk.f32.vlgmr.msra.gmra.mxu3 %vm2636_vm0, %v139_v15  ;;  %125 = vmatpush.msra.mxu0 %v85_v19  ;;  %v1738_v46 = vld [vmem:[%s2675_s1] ss:$0 sm:$0xff]  ;;  %v2074_v15 = vadd.s32 16, %v2051_v3 }
  0x24   :  { %259 = vmatpush.msrb.mxu3 %v232_v17  ;;  %1630 = vmatmul.msk.f32.vlgmr.msra.gmra.mxu0 %vm2636_vm0, %v81_v20  ;;  %v210_v8 = vld [vmem:[%s2614_s9] sm:$0xff]  ;;  %vm364_vm4 = vcmp.eq.s32.totalorder %v2064_v13, %v2053_v4  ;;  %v2085_v17 = vadd.s32 24, %v2051_v3  ;;  %v2088_v18 = vadd.s32 32, %v2064_v13  ;;  %v613_v19 = vadd.s32 16, %v2064_v13 }
  0x25   :  { %193 = vmatpush.msrb.mxu0 %v172_v22  ;;  %298 = vmatpush.msra.mxu2 %v276_v41  ;;  %v2071_v14 = vsel %vm364_vm4, 1.0, %v1756_v11  ;;  %vm365_vm5 = vcmp.eq.s32.totalorder %v2074_v15, %v2053_v4  ;;  %vm2637_vm6 = vcmp.eq.s32.totalorder %v2053_v4, %v2064_v13  ;;  %v619_v20 = vadd.s32 48, %v2064_v13  ;;  %v336_v41 = vld [vmem:[%s2616_s21 + $0x8] sm:$0xff] }
  0x26   :  { %260 = vmatpush.msrb.mxu3 %v231_v21  ;;  %v1642_v16 = vsel %vm365_vm5, 1.0, %v1756_v11  ;;  %vm2638_vm7 = vcmp.eq.s32.totalorder %v2053_v4, %v2088_v18  ;;  %vm614_vm8 = vcmp.eq.s32.totalorder %v2053_v4, %v613_v19  ;;  %vm2648_vm9 = vcmp.eq.s32.totalorder %v2085_v17, %v2053_v4 }
  0x27   :  { %299 = vmatpush.msra.mxu2 %v275_v43  ;;  %vm621_vm10 = vcmp.eq.s32.totalorder %v2053_v4, %v619_v20  ;;  %v2102_v21 = vadd.s32 32, %v2051_v3  ;;  %v2105_v22 = vadd.s32 32, %v2053_v4  ;;  %vm616_vm11 = vmor %vm2637_vm6, %vm614_vm8  ;;  %v510_v19 = vadd.s32 16, %v2053_v4 }
  0x28   :  { %261 = vmatpush.msrb.mxu3 %v230_v23  ;;  %1638 = vmatmul.msk.f32.vlgmr.msra.gmra.mxu2 %vm2650_vm2, %v274_v44  ;;  %vm618_vm12 = vmor %vm616_vm11, %vm2638_vm7  ;;  %v1643_v23 = vsel %vm2648_vm9, 1.0, %v1756_v11  ;;  %v595_v43 = vadd.s32 96, %v2074_v15 }
  0x29   :  { %vm2117_vm13 = vmor %vm618_vm12, %vm621_vm10  ;;  %vm2645_vm14 = vcmp.eq.s32.totalorder %v2102_v21, %v2053_v4  ;;  %vm2644_vm15 = vcmp.eq.s32.totalorder %v2102_v21, %v2105_v22  ;;  %vm2642_vm6 = vcmp.eq.s32.totalorder %v2053_v4, %v2102_v21 }
  0x2a   :  { %262 = vmatpush.msrb.mxu3 %v229_v24  ;;  %vm400_vm3 = vmor %vm2645_vm14, %vm2644_vm15  ;;  %v535_v24 = vadd.s32 48, %v2053_v4 }
  0x2c   :  { %263 = vmatpush.msrb.mxu3 %v228_v25  ;;  %1631 = vmatmul.msk.f32.gmra.mxu0 %vm2636_vm0, %v82_v26  ;;  %v1757_v25 = vmov 1.0   ;;  %v2139_v26 = vadd.s32 40, %v2051_v3 }
  0x2d   :  { %1686 = vmatpush.msk.msra.mxu0 %vm2117_vm13, %v1757_v25 }
  0x2e   :  { %264 = vmatpush.msrb.mxu3 %v227_v27  ;;  %v1644_v27 = vsel %vm400_vm3, 1.0, %v1756_v11  ;;  %vm2640_vm4 = vcmp.eq.s32.totalorder %v2139_v26, %v2053_v4  ;;  %vm2639_vm8 = vcmp.eq.s32.totalorder %v2139_v26, %v2105_v22  ;;  %vm2641_vm3 = vcmp.eq.s32.totalorder %v2053_v4, %v2051_v3 }
  0x2f   :  { %vm401_vm10 = vmor %vm2640_vm4, %vm2639_vm8 }
  0x30   :  { %265 = vmatpush.msrb.mxu3 %v226_v28 }
  0x32   :  { %266 = vmatpush.msrb.mxu3 %v225_v29 }
  0x33   :  { %1636 = vmatmul.msk.f32.vlgmr.msrb.gmra.mxu3 %vm2636_vm0, %v223_v30  ;;  %v1645_v30 = vsel %vm401_vm10, 1.0, %v1756_v11  ;;  %vm2643_vm10 = vcmp.eq.s32.totalorder %v2053_v4, %v2074_v15 }
  0x34   :  { %1632 = vmatmul.msk.f32.gmra.mxu0 %vm2636_vm0, %v83_v31  ;;  %1704 = vmatpush.msk.msra.mxu3 %vm2117_vm13, %v1757_v25  ;;  %vm615_vm7 = vmor %vm2641_vm3, %vm2643_vm10 }
  0x35   :  { %vm617_vm8 = vmor %vm615_vm7, %vm2642_vm6 }
  0x3b   :  { %1637 = vmatmul.msk.f32.gmra.mxu3 %vm2636_vm0, %v224_v32 }
  0x3c   :  { %1633 = vmatmul.msk.f32.gmra.mxu0 %vm2636_vm0, %v84_v33 }
  0x8b   :  { %v243_v29 = vpop.permute.xlu0 %242 }
  0x93   :  { %v238_v33 = vpop.permute.xlu0 %237 }
  0xa1   :  { %v127_v37 = vpop.f32.mrf.mxu0 }
  0xa2   :  { %v128_v49 = vadd.f32 %v1738_v46, %v127_v37  ;;  %v2159_v37 = vadd.s32 48, %v2051_v3 }
  0xa4   :  { %vm369_vm11 = vcmp.eq.s32.totalorder %v2159_v37, %v2053_v4  ;;  %vm2649_vm12 = vcmp.eq.s32.totalorder %v2159_v37, %v2105_v22  ;;  %vm620_vm4 = vcmp.eq.s32.totalorder %v2053_v4, %v2159_v37 }
  0xa5   :  { %vm402_vm0 = vmor %vm369_vm11, %vm2649_vm12 }
  0xa6   :  { %v169_v39 = vpop.f32.mrf.mxu3  ;;  %vm2196_vm3 = vmor %vm617_vm8, %vm620_vm4 }
  0xa7   :  { %v170_v40 = vadd.f32 %v169_v39, %v148_v38  ;;  %1705 = vmatpush.msk.msra.mxu3 %vm2196_vm3, %v1757_v25  ;;  %1687 = vmatpush.msk.msra.mxu0 %vm2196_vm3, %v1757_v25 }
  0xa9   :  { %1635 = vmatmul.msk.f32.vlgmr.msrb.gmra.mxu0 %vm174_vm1, %v170_v40  ;;  %v130_v42 = vpop.f32.mrf.mxu0  ;;  %v1646_v40 = vsel %vm402_vm0, 1.0, %v1756_v11 }
  0xaa   :  { %v131_v48 = vadd.f32 %v1738_v46, %v130_v42  ;;  %v331_v42 = vld [vmem:[%s2615_s20] sm:$0xff] }
  0xb1   :  { %v133_v45 = vpop.f32.mrf.mxu0 }
  0xb2   :  { %v134_v47 = vadd.f32 %v1738_v46, %v133_v45 }
  0xb4   :  { %1739 = vtanh.f32 %v134_v47 }
  0xb5   :  { %1741 = vtanh.f32 %v131_v48  ;;  %v2210_v48 = vadd.s32 56, %v2051_v3 }
  0xb6   :  { %1743 = vtanh.f32 %v128_v49  ;;  %v268_v28 = vpop.f32.mrf.mxu3 }
  0xb7   :  { %v269_v34 = vadd.f32 %v268_v28, %v238_v33  ;;  %vm2647_vm0 = vcmp.eq.s32.totalorder %v2210_v48, %v2053_v4  ;;  %vm2646_vm7 = vcmp.eq.s32.totalorder %v2210_v48, %v2105_v22  ;;  %v2681_v28 = vmov 0 }
  0xb8   :  { %vm403_vm4 = vmor %vm2647_vm0, %vm2646_vm7 }
  0xb9   :  { %v136_v50 = vpop.f32.mrf.mxu0  ;;  %v1647_v49 = vsel %vm403_vm4, 1.0, %v1756_v11 }
  0xba   :  { %v137_v51 = vadd.f32 %v1738_v46, %v136_v50  ;;  %v1740_v52 = vpop.eup %1739  ;;  %v335_v46 = vld [vmem:[%s2616_s21] sm:$0xff]  ;;  %v2225_v50 = vadd.s32 64, %v2051_v3 }
  0xbb   :  { %v1742_v54 = vpop.eup %1741  ;;  %v208_v59 = vmul.f32 %v1740_v52, %v204_v53  ;;  %v354_v53 = vadd.s32 72, %v2051_v3 }
  0xbc   :  { %1745 = vtanh.f32 %v137_v51  ;;  %v1744_v58 = vpop.eup %1743  ;;  %v207_v1 = vmul.f32 %v1742_v54, %v203_v56  ;;  %v2228_v51 = vadd.s32 64, %v2053_v4  ;;  %vm371_vm8 = vcmp.eq.s32.totalorder %v2225_v50, %v2053_v4 }
  0xbd   :  { %v216_v6 = vadd.f32 %v212_v62, %v208_v59  ;;  %v206_v7 = vmul.f32 %v1744_v58, %v202_v63  ;;  %vm388_vm6 = vcmp.eq.s32.totalorder %v2225_v50, %v2105_v22  ;;  %vm372_vm4 = vcmp.eq.s32.totalorder %v354_v53, %v2053_v4  ;;  %v221_v63 = vld [vmem:[%s2619_s11] sm:$0x1] }
  0xbe   :  { %v215_v9 = vadd.f32 %v211_v2, %v207_v1  ;;  %v271_v31 = vpop.f32.mrf.mxu3  ;;  %vm421_vm10 = vcmp.eq.s32.totalorder %v2225_v50, %v2228_v51  ;;  %vm404_vm15 = vmor %vm371_vm8, %vm388_vm6  ;;  %vm389_vm7 = vcmp.eq.s32.totalorder %v354_v53, %v2105_v22  ;;  %vm422_vm0 = vcmp.eq.s32.totalorder %v354_v53, %v2228_v51 }
  0xbf   :  { %v214_v10 = vadd.f32 %v210_v8, %v206_v7  ;;  %v272_v32 = vadd.f32 %v271_v31, %v243_v29  ;;  %vm437_vm14 = vmor %vm404_vm15, %vm421_vm10  ;;  %v355_v56 = vadd.s32 80, %v2051_v3  ;;  %v2273_v7 = vadd.s32 96, %v2053_v4 }
  0xc0   :  { %v1648_v52 = vsel %vm437_vm14, 1.0, %v1756_v11  ;;  %vm405_vm9 = vmor %vm372_vm4, %vm389_vm7  ;;  %v360_v29 = vadd.s32 120, %v2051_v3 }
  0xc1   :  { %1747 = vtanh.f32 %v272_v32  ;;  %vm438_vm12 = vmor %vm405_vm9, %vm422_vm0  ;;  %vm373_vm6 = vcmp.eq.s32.totalorder %v355_v56, %v2053_v4  ;;  %vm390_vm14 = vcmp.eq.s32.totalorder %v355_v56, %v2105_v22  ;;  %vm423_vm15 = vcmp.eq.s32.totalorder %v355_v56, %v2228_v51 }
  0xc2   :  { %v1746_v60 = vpop.eup %1745  ;;  %1749 = vtanh.f32 %v269_v34  ;;  %v1649_v54 = vsel %vm438_vm12, 1.0, %v1756_v11  ;;  %vm406_vm10 = vmor %vm373_vm6, %vm390_vm14  ;;  %vm2651_vm6 = vcmask 130048  }
  0xc3   :  { %v209_v0 = vmul.f32 %v1746_v60, %v205_v55  ;;  %v173_v55 = vld [vmem:[%s2617_s7] sm:$0x1]  ;;  %vm439_vm9 = vmor %vm406_vm10, %vm423_vm15  ;;  %v356_v60 = vadd.s32 88, %v2051_v3 }
  0xc4   :  { %v1650_v59 = vsel %vm439_vm9, 1.0, %v1756_v11 }
  0xc5   :  { %v217_v5 = vadd.f32 %v213_v61, %v209_v0  ;;  %v219_v61 = vld [vmem:[%s2618_s10] sm:$0x1]  ;;  %vm374_vm12 = vcmp.eq.s32.totalorder %v356_v60, %v2053_v4  ;;  %vm391_vm0 = vcmp.eq.s32.totalorder %v356_v60, %v2105_v22  ;;  %vm424_vm7 = vcmp.eq.s32.totalorder %v356_v60, %v2228_v51 }
  0xc6   :  { %vm407_vm8 = vmor %vm374_vm12, %vm391_vm0 }
  0xc7   :  { %688 = vmatpush.msra.mxu1 %v217_v5  ;;  %v1748_v35 = vpop.eup %1747  ;;  %vm440_vm4 = vmor %vm407_vm8, %vm424_vm7  ;;  %v304_v5 = vld [vmem:[%s2620_s18] sm:$0xff] }
  0xc8   :  { %v334_v38 = vmul.f32 %v1748_v35, %v332_v36  ;;  %v1750_v39 = vpop.eup %1749  ;;  %v1651_v1 = vsel %vm440_vm4, 1.0, %v1756_v11  ;;  %324 = vmatpush.msrb.mxu2 %v304_v5 }
  0xc9   :  { %689 = vmatpush.msra.mxu1 %v216_v6  ;;  %v333_v45 = vmul.f32 %v1750_v39, %v331_v42  ;;  %v2270_v6 = vadd.s32 96, %v2051_v3  ;;  %v574_v39 = vadd.s32 32, %v2085_v17  ;;  %v584_v42 = vadd.s32 64, %v2074_v15 }
  0xca   :  { %v338_v44 = vadd.f32 %v336_v41, %v334_v38  ;;  %1732 = vmatpush.msk.msra.mxu2 %vm2117_vm13, %v1757_v25  ;;  %v573_v41 = vadd.s32 32, %v2074_v15 }
  0xcb   :  { %690 = vmatpush.msra.mxu1 %v215_v9  ;;  %v337_v47 = vadd.f32 %v335_v46, %v333_v45  ;;  %vm375_vm14 = vcmp.eq.s32.totalorder %v2270_v6, %v2053_v4  ;;  %vm392_vm15 = vcmp.eq.s32.totalorder %v2270_v6, %v2105_v22  ;;  %vm425_vm10 = vcmp.eq.s32.totalorder %v2270_v6, %v2228_v51  ;;  %v279_v9 = vld [vmem:[%s2621_s17] sm:$0x1] }
  0xcc   :  { %1326 = vmatpush.msrb.mxu3 %v338_v44  ;;  %vm458_vm9 = vcmp.eq.s32.totalorder %v2270_v6, %v2273_v7  ;;  %vm408_vm12 = vmor %vm375_vm14, %vm392_vm15  ;;  %1733 = vmatpush.msk.msra.mxu2 %vm2196_vm3, %v1757_v25 }
  0xcd   :  { %691 = vmatpush.msra.mxu1 %v214_v10  ;;  %vm441_vm0 = vmor %vm408_vm12, %vm425_vm10  ;;  %v301_v10 = vpop.f32.mrf.mxu2  ;;  %vm513_vm10 = vcmp.eq.s32.totalorder %v2074_v15, %v510_v19 }
  0xce   :  { %1670 = vmatmul.msk.f32.vlgmr.msra.gmra.mxu1 %vm2650_vm2, %v2061_v12  ;;  %1327 = vmatpush.msrb.mxu3 %v337_v47  ;;  %vm474_vm7 = vmor %vm441_vm0, %vm458_vm9  ;;  %v302_v20 = vadd.f32 %v301_v10, %v279_v9  ;;  %v594_v47 = vadd.s32 96, %v2064_v13 }
  0xcf   :  { %v1652_v8 = vsel %vm474_vm7, 1.0, %v1756_v11  ;;  %vm521_vm12 = vmor %vm365_vm5, %vm513_vm10 }
  0xd0   :  { %1639 = vmatmul.msk.f32.vlgmr.msrb.gmra.mxu2 %vm174_vm1, %v302_v20  ;;  %vm517_vm1 = vcmp.eq.s32.totalorder %v2159_v37, %v510_v19 }
  0xd1   :  { %vm525_vm0 = vmor %vm369_vm11, %vm517_vm1  ;;  %vm514_vm11 = vcmp.eq.s32.totalorder %v2085_v17, %v510_v19 }
  0xd6   :  { %1671 = vmatmul.msk.f32.gmra.mxu1 %vm2650_vm2, %v2071_v14 }
  0xde   :  { %1672 = vmatmul.msk.f32.gmra.mxu1 %vm2650_vm2, %v1642_v16  ;;  %v358_v16 = vadd.s32 104, %v2051_v3 }
  0xe0   :  { %vm376_vm13 = vcmp.eq.s32.totalorder %v358_v16, %v2053_v4  ;;  %vm393_vm3 = vcmp.eq.s32.totalorder %v358_v16, %v2105_v22  ;;  %vm426_vm8 = vcmp.eq.s32.totalorder %v358_v16, %v2228_v51  ;;  %vm459_vm4 = vcmp.eq.s32.totalorder %v358_v16, %v2273_v7 }
  0xe1   :  { %vm409_vm14 = vmor %vm376_vm13, %vm393_vm3 }
  0xe2   :  { %vm442_vm15 = vmor %vm409_vm14, %vm426_vm8  ;;  %vm2680_vm8 = vcmp.eq.s32.totalorder %v2159_v37, %v2105_v22 }
  0xe3   :  { %vm475_vm9 = vmor %vm442_vm15, %vm459_vm4  ;;  %vm542_vm15 = vcmp.eq.s32.totalorder %v2159_v37, %v535_v24 }
  0xe4   :  { %vm533_vm4 = vmor %vm525_vm0, %vm2680_vm8  ;;  %vm2683_vm0 = vcmp.eq.s32.totalorder %v2085_v17, %v2053_v4  ;;  %vm395_vm8 = vcmp.eq.s32.totalorder %v360_v29, %v2105_v22 }
  0xe5   :  { %vm2328_vm1 = vmor %vm533_vm4, %vm542_vm15  ;;  %vm428_vm4 = vcmp.eq.s32.totalorder %v360_v29, %v2228_v51  ;;  %vm2685_vm15 = vcmp.eq.s32.totalorder %v2210_v48, %v2105_v22 }
  0xe6   :  { %1673 = vmatmul.msk.f32.gmra.mxu1 %vm2650_vm2, %v1643_v23  ;;  %v359_v23 = vadd.s32 112, %v2051_v3  ;;  %v2682_v28 = vsel %vm2328_vm1, 4294967295, %v2681_v28 }
  0xe8   :  { %vm377_vm7 = vcmp.eq.s32.totalorder %v359_v23, %v2053_v4  ;;  %vm394_vm13 = vcmp.eq.s32.totalorder %v359_v23, %v2105_v22  ;;  %vm427_vm3 = vcmp.eq.s32.totalorder %v359_v23, %v2228_v51  ;;  %vm460_vm5 = vcmp.eq.s32.totalorder %v359_v23, %v2273_v7 }
  0xe9   :  { %vm410_vm14 = vmor %vm377_vm7, %vm394_vm13  ;;  %vm2684_vm13 = vcmp.eq.s32.totalorder %v2210_v48, %v2053_v4 }
  0xea   :  { %vm443_vm10 = vmor %vm410_vm14, %vm427_vm3  ;;  %vm461_vm14 = vcmp.eq.s32.totalorder %v360_v29, %v2273_v7 }
  0xeb   :  { %vm522_vm7 = vmor %vm2683_vm0, %vm514_vm11  ;;  %vm515_vm0 = vcmp.eq.s32.totalorder %v2102_v21, %v510_v19 }
  0xee   :  { %1674 = vmatmul.msk.f32.gmra.mxu1 %vm2650_vm2, %v1644_v27 }
  0xf6   :  { %1675 = vmatmul.msk.f32.gmra.mxu1 %vm2650_vm2, %v1645_v30  ;;  %v1659_v30 = vsel %vm522_vm7, 1.0, %v1756_v11 }
  0xfe   :  { %1676 = vmatmul.msk.f32.gmra.mxu1 %vm2650_vm2, %v1646_v40  ;;  %v585_v40 = vadd.s32 64, %v2085_v17 }
 0x106   :  { %1677 = vmatmul.msk.f32.gmra.mxu1 %vm2650_vm2, %v1647_v49 }
 0x10e   :  { %1678 = vmatmul.msk.f32.gmra.mxu1 %vm2650_vm2, %v1648_v52 }
 0x116   :  { %1679 = vmatmul.msk.f32.gmra.mxu1 %vm2650_vm2, %v1649_v54 }
 0x11e   :  { %1680 = vmatmul.msk.f32.gmra.mxu1 %vm2650_vm2, %v1650_v59 }
 0x126   :  { %v195_v57 = vpop.f32.mrf.mxu0  ;;  %1681 = vmatmul.msk.f32.gmra.mxu1 %vm2650_vm2, %v1651_v1 }
 0x127   :  { %v196_v58 = vadd.f32 %v195_v57, %v173_v55  ;;  %v340_v55 = vld [vmem:[%s2624_s22] sm:$0x1] }
 0x129   :  { %1751 = vtanh.f32 %v196_v58  ;;  %v342_v58 = vld [vmem:[%s2625_s23] sm:$0x1] }
 0x12e   :  { %1682 = vmatmul.msk.f32.gmra.mxu1 %vm2650_vm2, %v1652_v8 }
 0x12f   :  { %v1752_v62 = vpop.eup %1751 }
 0x130   :  { %v220_v0 = vmul.f32 %v1752_v62, %v219_v61 }
 0x132   :  { %v222_v2 = vadd.f32 %v221_v63, %v220_v0 }
 0x134   :  { %1706 = vmatmul.msk.f32.vlgmr.msra.gmra.mxu3 %vm2651_vm6, %v222_v2 }
 0x13c   :  { %1707 = vmatmul.msk.f32.vlgmr.msrb.gmra.mxu3 %vm2651_vm6, %v2061_v12  ;;  %v1653_v12 = vsel %vm475_vm9, 1.0, %v1756_v11  ;;  %vm476_vm9 = vmor %vm443_vm10, %vm460_vm5  ;;  %vm378_vm5 = vcmp.eq.s32.totalorder %v360_v29, %v2053_v4 }
 0x13d   :  { %1683 = vmatmul.msk.f32.gmra.mxu1 %vm2650_vm2, %v1653_v12  ;;  %v1654_v27 = vsel %vm476_vm9, 1.0, %v1756_v11  ;;  %vm411_vm11 = vmor %vm378_vm5, %vm395_vm8  ;;  %vm543_vm9 = vcmp.eq.s32.totalorder %v2210_v48, %v535_v24  ;;  %vm2690_vm5 = vcmask 261120  }
 0x144   :  { %1708 = vmatmul.msk.f32.gmra.mxu3 %vm2651_vm6, %v2071_v14  ;;  %v1658_v14 = vsel %vm521_vm12, 1.0, %v1756_v11  ;;  %vm518_vm12 = vcmp.eq.s32.totalorder %v2210_v48, %v510_v19 }
 0x145   :  { %1684 = vmatmul.msk.f32.gmra.mxu1 %vm2650_vm2, %v1654_v27  ;;  %vm526_vm3 = vmor %vm2684_vm13, %vm518_vm12 }
 0x146   :  { %vm534_vm10 = vmor %vm526_vm3, %vm2685_vm15  ;;  %vm2689_vm3 = vcmask 130048  }
 0x147   :  { %vm444_vm2 = vmor %vm411_vm11, %vm428_vm4  ;;  %vm516_vm4 = vcmp.eq.s32.totalorder %v2139_v26, %v510_v19  ;;  %vm2696_vm11 = vcmp.eq.s32.totalorder %v2139_v26, %v2105_v22 }
 0x148   :  { %vm477_vm12 = vmor %vm444_vm2, %vm461_vm14  ;;  %vm2692_vm2 = vcmp.eq.s32.totalorder %v2102_v21, %v2105_v22  ;;  %vm2693_vm14 = vcmp.eq.s32.totalorder %v2139_v26, %v2053_v4  ;;  %v596_v22 = vadd.s32 96, %v2085_v17 }
 0x149   :  { %v1655_v31 = vsel %vm477_vm12, 1.0, %v1756_v11  ;;  %vm2353_vm13 = vmor %vm534_vm10, %vm543_vm9  ;;  %vm2699_vm12 = vnez %v2682_v28 }
 0x14a   :  { %vm2691_vm8 = vmmov %vm2689_vm3  ;;  %v1662_v38 = vsel %vm2699_vm12, 1.0, %v1756_v11 }
 0x14b   :  { %v693_v33 = vpop.f32.mrf.mxu1  ;;  %vm524_vm15 = vmor %vm2693_vm14, %vm516_vm4 }
 0x14c   :  { %1709 = vmatmul.msk.f32.gmra.mxu3 %vm2651_vm6, %v1658_v14  ;;  %vm2688_vm6 = vcmp.eq.s32.totalorder %v2102_v21, %v2053_v4  ;;  %1688 = vmatmul.msk.f32.vlgmr.msra.gmra.mxu0 %vm2691_vm8, %v693_v33  ;;  %vm2695_vm10 = vmmov %vm2689_vm3  ;;  %vm578_vm8 = vcmp.eq.s32.totalorder %v2053_v4, %v574_v39 }
 0x14d   :  { %vm523_vm1 = vmor %vm2688_vm6, %vm515_vm0  ;;  %1685 = vmatmul.msk.f32.gmra.mxu1 %vm2690_vm5, %v1655_v31 }
 0x14e   :  { %vm531_vm7 = vmor %vm523_vm1, %vm2692_vm2  ;;  %vm589_vm2 = vcmp.eq.s32.totalorder %v2053_v4, %v585_v40 }
 0x14f   :  { %v1660_v34 = vsel %vm531_vm7, 1.0, %v1756_v11  ;;  %vm2694_vm6 = vmmov %vm2689_vm3  ;;  %vm600_vm7 = vcmp.eq.s32.totalorder %v2053_v4, %v596_v22 }
 0x150   :  { %vm532_vm9 = vmor %vm524_vm15, %vm2696_vm11  ;;  %vm577_vm11 = vcmp.eq.s32.totalorder %v2053_v4, %v573_v41 }
 0x151   :  { %v1661_v36 = vsel %vm532_vm9, 1.0, %v1756_v11  ;;  %vm2697_vm1 = vmmov %vm2689_vm3  ;;  %vm588_vm9 = vcmp.eq.s32.totalorder %v2053_v4, %v584_v42 }
 0x152   :  { %vm2698_vm0 = vmmov %vm2697_vm1 }
 0x153   :  { %v696_v35 = vpop.f32.mrf.mxu1  ;;  %vm2700_vm5 = vmmov %vm2698_vm0  ;;  %v326_v52 = vpop.f32.mrf.mxu2 }
 0x154   :  { %1710 = vmatmul.msk.f32.gmra.mxu3 %vm2689_vm3, %v1659_v30  ;;  %1689 = vmatmul.msk.f32.gmra.mxu0 %vm2695_vm10, %v696_v35  ;;  %vm571_vm3 = vcmp.eq.s32.totalorder %v2053_v4, %v2085_v17  ;;  %vm2701_vm4 = vmmov %vm2698_vm0  ;;  %v1663_v17 = vsel %vm2353_vm13, 1.0, %v1756_v11  ;;  %vm2703_vm13 = vcmp.eq.s32.totalorder %v2053_v4, %v2074_v15  ;;  %v583_v15 = vadd.s32 64, %v2064_v13 }
 0x155   :  { %vm582_vm14 = vmor %vm571_vm3, %vm578_vm8 }
 0x156   :  { %vm593_vm15 = vmor %vm582_vm14, %vm589_vm2  ;;  %vm2708_vm14 = vcmp.eq.s32.totalorder %v2053_v4, %v2064_v13 }
 0x157   :  { %vm2702_vm10 = vmmov %vm2698_vm0 }
 0x158   :  { %vm581_vm12 = vmor %vm2703_vm13, %vm577_vm11  ;;  %vm2710_vm11 = vcmp.eq.s32.totalorder %v2053_v4, %v2051_v3 }
 0x159   :  { %vm592_vm3 = vmor %vm581_vm12, %vm588_vm9 }
 0x15a   :  { %vm2704_vm8 = vmmov %vm2698_vm0 }
 0x15b   :  { %v699_v37 = vpop.f32.mrf.mxu1  ;;  %vm2705_vm2 = vmmov %vm2698_vm0 }
 0x15c   :  { %1711 = vmatmul.msk.f32.gmra.mxu3 %vm2694_vm6, %v1660_v34  ;;  %1690 = vmatmul.msk.f32.vlgmr.msra.gmra.mxu2 %vm2698_vm0, %v699_v37  ;;  %vm604_vm6 = vmor %vm593_vm15, %vm600_vm7 }
 0x15d   :  { %1715 = vmatpush.msk.msrb.mxu0 %vm604_vm6, %v1757_v25  ;;  %1727 = vmatpush.msk.msra.mxu3 %vm604_vm6, %v1757_v25  ;;  %vm2706_vm7 = vmmov %vm2698_vm0  ;;  %vm586_vm6 = vcmp.eq.s32.totalorder %v2053_v4, %v2225_v50 }
 0x15e   :  { %vm2711_vm13 = vmmov %vm2705_vm2 }
 0x163   :  { %v702_v26 = vpop.f32.mrf.mxu1 }
 0x164   :  { %1712 = vmatmul.msk.f32.gmra.mxu3 %vm2697_vm1, %v1661_v36  ;;  %1691 = vmatmul.msk.f32.gmra.mxu2 %vm2701_vm4, %v702_v26  ;;  %vm599_vm1 = vcmp.eq.s32.totalorder %v2053_v4, %v595_v43  ;;  %vm2707_vm4 = vcmp.eq.s32.totalorder %v2053_v4, %v2088_v18 }
 0x165   :  { %vm580_vm15 = vmor %vm2708_vm14, %vm2707_vm4 }
 0x166   :  { %vm2712_vm4 = vmmov %vm2706_vm7 }
 0x167   :  { %vm2713_vm14 = vmmov %vm2712_vm4 }
 0x16b   :  { %v705_v44 = vpop.f32.mrf.mxu1 }
 0x16c   :  { %1713 = vmatmul.msk.f32.gmra.mxu3 %vm2700_vm5, %v1662_v38  ;;  %1692 = vmatmul.msk.f32.gmra.mxu2 %vm2698_vm0, %v705_v44  ;;  %vm603_vm5 = vmor %vm592_vm3, %vm599_vm1  ;;  %vm587_vm1 = vcmp.eq.s32.totalorder %v2053_v4, %v583_v15  ;;  %vm598_vm0 = vcmp.eq.s32.totalorder %v2053_v4, %v594_v47  ;;  %vm597_vm3 = vcmp.eq.s32.totalorder %v2053_v4, %v2270_v6 }
 0x16d   :  { %1716 = vmatpush.msk.msrb.mxu0 %vm603_vm5, %v1757_v25  ;;  %1728 = vmatpush.msk.msra.mxu3 %vm603_vm5, %v1757_v25  ;;  %vm591_vm5 = vmor %vm580_vm15, %vm587_vm1  ;;  %vm1286_vm15 = vcmask 516096  }
 0x16e   :  { %vm2718_vm1 = vmmov %vm2712_vm4 }
 0x173   :  { %v708_v11 = vpop.f32.mrf.mxu1 }
 0x174   :  { %1714 = vmatmul.msk.f32.gmra.mxu3 %vm2702_vm10, %v1663_v17  ;;  %1693 = vmatmul.msk.f32.gmra.mxu2 %vm2704_vm8, %v708_v11  ;;  %vm2709_vm10 = vcmp.eq.s32.totalorder %v2053_v4, %v2102_v21  ;;  %vm602_vm8 = vmor %vm591_vm5, %vm598_vm0  ;;  %vm2722_vm5 = vcmask 523264  }
 0x175   :  { %vm579_vm9 = vmor %vm2710_vm11, %vm2709_vm10  ;;  %1717 = vmatpush.msk.msrb.mxu0 %vm602_vm8, %v1757_v25  ;;  %1729 = vmatpush.msk.msra.mxu3 %vm602_vm8, %v1757_v25  ;;  %vm2715_vm10 = vcmask 261120  }
 0x176   :  { %vm590_vm12 = vmor %vm579_vm9, %vm586_vm6 }
 0x177   :  { %vm2714_vm6 = vmmov %vm2712_vm4 }
 0x178   :  { %vm2716_vm11 = vmmov %vm2712_vm4 }
 0x179   :  { %vm2717_vm9 = vmmov %vm2715_vm10 }
 0x17a   :  { %vm2719_vm0 = vmmov %vm2717_vm9 }
 0x17b   :  { %v711_v45 = vpop.f32.mrf.mxu1  ;;  %vm2723_vm8 = vmmov %vm2719_vm0 }
 0x17c   :  { %1694 = vmatmul.msk.f32.gmra.mxu2 %vm2705_vm2, %v711_v45  ;;  %vm601_vm2 = vmor %vm590_vm12, %vm597_vm3  ;;  %vm920_vm12 = vcmp.lt.s32.totalorder %v2053_v4, 16 }
 0x17d   :  { %1718 = vmatpush.msk.msrb.mxu0 %vm601_vm2, %v1757_v25  ;;  %1730 = vmatpush.msk.msra.mxu3 %vm601_vm2, %v1757_v25  ;;  %v305_v25 = vld [vmem:[%s2623_s19] sm:$0x1]  ;;  %vm2721_vm3 = vmmov %vm2718_vm1 }
 0x17e   :  { %v327_v53 = vadd.f32 %v326_v52, %v305_v25  ;;  %vm2724_vm2 = vmmov %vm2722_vm5 }
 0x180   :  { %1753 = vtanh.f32 %v327_v53 }
 0x183   :  { %v714_v46 = vpop.f32.mrf.mxu1 }
 0x184   :  { %1695 = vmatmul.msk.f32.gmra.mxu2 %vm2706_vm7, %v714_v46 }
 0x186   :  { %v1754_v57 = vpop.eup %1753 }
 0x187   :  { %v341_v59 = vmul.f32 %v1754_v57, %v340_v55 }
 0x189   :  { %v343_v60 = vadd.f32 %v342_v58, %v341_v59 }
 0x18b   :  { %v717_v48 = vpop.f32.mrf.mxu1 }
 0x18c   :  { %1696 = vmatmul.msk.f32.gmra.mxu2 %vm2711_vm13, %v717_v48  ;;  %vm2720_vm13 = vmmov %vm2719_vm0 }
 0x18d   :  { %1731 = vmatmul.msk.f32.vlgmr.msra.gmra.mxu3 %vm2720_vm13, %v343_v60 }
 0x193   :  { %v720_v3 = vpop.f32.mrf.mxu1 }
 0x194   :  { %1697 = vmatmul.msk.f32.gmra.mxu2 %vm2706_vm7, %v720_v3  ;;  %vm2725_vm7 = vmmov %vm2719_vm0 }
 0x19b   :  { %v723_v13 = vpop.f32.mrf.mxu1 }
 0x19c   :  { %1698 = vmatmul.msk.f32.gmra.mxu2 %vm2712_vm4, %v723_v13  ;;  %vm2726_vm4 = vmmov %vm2719_vm0 }
 0x1a3   :  { %v726_v18 = vpop.f32.mrf.mxu1 }
 0x1a4   :  { %1699 = vmatmul.msk.f32.gmra.mxu2 %vm2713_vm14, %v726_v18  ;;  %vm2727_vm14 = vmmov %vm2724_vm2 }
 0x1ab   :  { %v729_v49 = vpop.f32.mrf.mxu1 }
 0x1ac   :  { %1700 = vmatmul.msk.f32.gmra.mxu2 %vm2714_vm6, %v729_v49  ;;  %vm2729_vm6 = vmmov %vm2724_vm2 }
 0x1b7   :  { %v1283_v21 = vpop.f32.mrf.mxu3 }
 0x1b8   :  { %1287 = vst.msk [vmem:[%s2622_s25] sm:$0x1] %vm1286_vm15, %v1283_v21  ;;  %vm2728_vm15 = vmmov %vm2719_vm0 }
 0x1ba   :  { %v732_v51 = vpop.f32.mrf.mxu1 }
 0x1bb   :  { %1701 = vmatmul.msk.f32.gmra.mxu2 %vm2716_vm11, %v732_v51  ;;  %vm1002_vm11 = vcmp.lt.s32.totalorder %v2053_v4, 32 }
 0x1bf   :  { %v1329_v50 = vpop.f32.mrf.mxu3 }
 0x1c0   :  { %1719 = vmatmul.msk.f32.vlgmr.msrb.gmra.mxu0 %vm2715_vm10, %v1329_v50  ;;  %vm985_vm10 = vcmp.ge.s32.totalorder %v2053_v4, 16 }
 0x1c2   :  { %v735_v56 = vpop.f32.mrf.mxu1 }
 0x1c3   :  { %1702 = vmatmul.msk.f32.gmra.mxu2 %vm2718_vm1, %v735_v56  ;;  %vm2730_vm1 = vmmov %vm2719_vm0 }
 0x1c7   :  { %v1332_v54 = vpop.f32.mrf.mxu3 }
 0x1c8   :  { %1720 = vmatmul.msk.f32.gmra.mxu0 %vm2717_vm9, %v1332_v54  ;;  %vm1007_vm9 = vmand %vm985_vm10, %vm1002_vm11  ;;  %vm1198_vm10 = vcmp.lt.s32.totalorder %v2053_v4, 64 }
 0x1c9   :  { %v807_v63 = vpop.f32.mrf.mxu0 }
 0x1ca   :  { %v738_v62 = vpop.f32.mrf.mxu1  ;;  %v1231_v0 = vsel %vm920_vm12, %v807_v63, 0.0 }
 0x1cb   :  { %1703 = vmatmul.msk.f32.gmra.mxu2 %vm2721_vm3, %v738_v62  ;;  %1247 = vst.msk [vmem:[%s2626_s24] sm:$0xff] %vm2722_vm5, %v1231_v0  ;;  %vm1083_vm5 = vcmp.ge.s32.totalorder %v2053_v4, 32 }
 0x1cf   :  { %v1335_v61 = vpop.f32.mrf.mxu3 }
 0x1d0   :  { %1721 = vmatmul.msk.f32.gmra.mxu0 %vm2719_vm0, %v1335_v61  ;;  %vm2731_vm0 = vmmov %vm2724_vm2 }
 0x1d1   :  { %v810_v2 = vpop.f32.mrf.mxu0  ;;  %vm2732_vm13 = vmmov %vm2731_vm0 }
 0x1d2   :  { %v1232_v5 = vsel %vm920_vm12, %v810_v2, 0.0  ;;  %vm2734_vm3 = vmmov %vm2731_vm0 }
 0x1d3   :  { %1248 = vst.msk [vmem:[%s2626_s24 + $0x8] sm:$0xff] %vm2724_vm2, %v1232_v5 }
 0x1d7   :  { %v1338_v1 = vpop.f32.mrf.mxu3 }
 0x1d8   :  { %1722 = vmatmul.msk.f32.gmra.mxu0 %vm2723_vm8, %v1338_v1  ;;  %vm1100_vm8 = vcmp.lt.s32.totalorder %v2053_v4, 48 }
 0x1d9   :  { %vm1109_vm2 = vmand %vm1083_vm5, %vm1100_vm8 }
 0x1df   :  { %v1341_v6 = vpop.f32.mrf.mxu3  ;;  %v813_v8 = vpop.f32.mrf.mxu2 }
 0x1e0   :  { %1723 = vmatmul.msk.f32.gmra.mxu0 %vm2725_vm7, %v1341_v6  ;;  %v1233_v9 = vsel %vm920_vm12, %v813_v8, 0.0  ;;  %vm2735_vm7 = vmmov %vm2731_vm0 }
 0x1e1   :  { %1249 = vst.msk [vmem:[%s2626_s24 + $0x10] sm:$0xff] %vm2727_vm14, %v1233_v9  ;;  %vm2737_vm14 = vmmov %vm2731_vm0 }
 0x1e7   :  { %v1344_v7 = vpop.f32.mrf.mxu3  ;;  %v816_v16 = vpop.f32.mrf.mxu2 }
 0x1e8   :  { %1724 = vmatmul.msk.f32.gmra.mxu0 %vm2726_vm4, %v1344_v7  ;;  %v1234_v19 = vsel %vm920_vm12, %v816_v16, 0.0  ;;  %vm2733_vm12 = vmmov %vm2731_vm0 }
 0x1e9   :  { %1250 = vst.msk [vmem:[%s2626_s24 + $0x18] sm:$0xff] %vm2729_vm6, %v1234_v19  ;;  %vm2736_vm4 = vmmov %vm2731_vm0  ;;  %vm1181_vm6 = vcmp.ge.s32.totalorder %v2053_v4, 48 }
 0x1ef   :  { %v1347_v10 = vpop.f32.mrf.mxu3  ;;  %v819_v12 = vpop.f32.mrf.mxu2 }
 0x1f0   :  { %1725 = vmatmul.msk.f32.gmra.mxu0 %vm2728_vm15, %v1347_v10  ;;  %v1235_v23 = vsel %vm1007_vm9, %v819_v12, 0.0  ;;  %vm2738_vm15 = vmmov %vm2731_vm0 }
 0x1f1   :  { %1251 = vst.msk [vmem:[%s2626_s24 + $0x20] sm:$0xff] %vm2731_vm0, %v1235_v23 }
 0x1f7   :  { %v1350_v20 = vpop.f32.mrf.mxu3  ;;  %v822_v24 = vpop.f32.mrf.mxu2 }
 0x1f8   :  { %1726 = vmatmul.msk.f32.gmra.mxu0 %vm2730_vm1, %v1350_v20  ;;  %v1236_v14 = vsel %vm1007_vm9, %v822_v24, 0.0  ;;  %vm2741_vm1 = vmmov %vm2731_vm0 }
 0x1f9   :  { %1252 = vst.msk [vmem:[%s2626_s24 + $0x28] sm:$0xff] %vm2732_vm13, %v1236_v14  ;;  %vm1476_vm13 = vmand %vm1083_vm5, %vm1198_vm10 }
 0x1fa   :  { %vm2743_vm5 = vmmov %vm2731_vm0 }
 0x1ff   :  { %v825_v27 = vpop.f32.mrf.mxu2 }
 0x200   :  { %v1237_v28 = vsel %vm1007_vm9, %v825_v27, 0.0 }
 0x201   :  { %1253 = vst.msk [vmem:[%s2626_s24 + $0x30] sm:$0xff] %vm2733_vm12, %v1237_v28  ;;  %vm1506_vm12 = vcmp.ge.s32.totalorder %v2053_v4, 64 }
 0x207   :  { %v828_v29 = vpop.f32.mrf.mxu2 }
 0x208   :  { %v1238_v30 = vsel %vm1007_vm9, %v828_v29, 0.0  ;;  %vm2535_vm9 = vmand %vm1181_vm6, %vm1198_vm10 }
 0x209   :  { %1254 = vst.msk [vmem:[%s2626_s24 + $0x38] sm:$0xff] %vm2734_vm3, %v1238_v30  ;;  %vm1515_vm3 = vcmp.lt.s32.totalorder %v2053_v4, 96 }
 0x20a   :  { %vm1520_vm8 = vmand %vm1506_vm12, %vm1515_vm3 }
 0x20f   :  { %v831_v31 = vpop.f32.mrf.mxu2 }
 0x210   :  { %v1239_v32 = vsel %vm1109_vm2, %v831_v31, 0.0  ;;  %v1610_v18 = vpop.f32.mrf.mxu3 }
 0x211   :  { %1255 = vst.msk [vmem:[%s2626_s24 + $0x40] sm:$0xff] %vm2735_vm7, %v1239_v32 }
 0x212   :  { %1613 = vst [vmem:[%s2628_s27] sm:$0x1] %v1610_v18 }
 0x217   :  { %v834_v33 = vpop.f32.mrf.mxu2 }
 0x218   :  { %v1240_v34 = vsel %vm1109_vm2, %v834_v33, 0.0 }
 0x219   :  { %1256 = vst.msk [vmem:[%s2626_s24 + $0x48] sm:$0xff] %vm2736_vm4, %v1240_v34 }
 0x21f   :  { %v837_v35 = vpop.f32.mrf.mxu2 }
 0x220   :  { %v1241_v36 = vsel %vm1109_vm2, %v837_v35, 0.0 }
 0x221   :  { %1257 = vst.msk [vmem:[%s2626_s24 + $0x50] sm:$0xff] %vm2737_vm14, %v1241_v36 }
 0x227   :  { %v840_v37 = vpop.f32.mrf.mxu2 }
 0x228   :  { %v1242_v38 = vsel %vm1109_vm2, %v840_v37, 0.0  ;;  %vm1548_vm2 = vcmp.ge.s32.totalorder %v2053_v4, 96 }
 0x229   :  { %1258 = vst.msk [vmem:[%s2626_s24 + $0x58] sm:$0xff] %vm2738_vm15, %v1242_v38 }
 0x22f   :  { %v843_v22 = vpop.f32.mrf.mxu2 }
 0x230   :  { %v1243_v17 = vsel %vm2535_vm9, %v843_v22, 0.0 }
 0x231   :  { %1259 = vst.msk [vmem:[%s2626_s24 + $0x60] sm:$0xff] %vm2741_vm1, %v1243_v17 }
 0x23d   :  { %v1394_v40 = vpop.f32.mrf.mxu0 }
 0x23e   :  { %v1574_v26 = vsel %vm1002_vm11, %v1394_v40, 0.0  ;;  %v846_v42 = vpop.f32.mrf.mxu2 }
 0x23f   :  { %1582 = vst [vmem:[%s2627_s26] sm:$0xff] %v1574_v26  ;;  %v1244_v44 = vsel %vm2535_vm9, %v846_v42, 0.0 }
 0x240   :  { %1260 = vst.msk [vmem:[%s2626_s24 + $0x68] sm:$0xff] %vm2731_vm0, %v1244_v44 }
 0x245   :  { %v1397_v41 = vpop.f32.mrf.mxu0 }
 0x246   :  { %v1575_v43 = vsel %vm1002_vm11, %v1397_v41, 0.0  ;;  %v849_v45 = vpop.f32.mrf.mxu2  ;;  %vm2742_vm11 = vmmov %vm2731_vm0 }
 0x247   :  { %1583 = vst [vmem:[%s2627_s26 + $0x8] sm:$0xff] %v1575_v43  ;;  %v1245_v15 = vsel %vm2535_vm9, %v849_v45, 0.0 }
 0x248   :  { %1261 = vst.msk [vmem:[%s2626_s24 + $0x70] sm:$0xff] %vm2742_vm11, %v1245_v15 }
 0x24d   :  { %v1400_v11 = vpop.f32.mrf.mxu0 }
 0x24e   :  { %v1576_v46 = vsel %vm1476_vm13, %v1400_v11, 0.0  ;;  %v852_v48 = vpop.f32.mrf.mxu2 }
 0x24f   :  { %1584 = vst [vmem:[%s2627_s26 + $0x10] sm:$0xff] %v1576_v46  ;;  %v1246_v13 = vsel %vm2535_vm9, %v852_v48, 0.0 }
 0x250   :  { %1262 = vst.msk [vmem:[%s2626_s24 + $0x78] sm:$0xff] %vm2743_vm5, %v1246_v13 }
 0x255   :  { %v1403_v47 = vpop.f32.mrf.mxu0 }
 0x256   :  { %v1577_v3 = vsel %vm1476_vm13, %v1403_v47, 0.0 }
 0x257   :  { %1585 = vst [vmem:[%s2627_s26 + $0x18] sm:$0xff] %v1577_v3 }
 0x25d   :  { %v1406_v21 = vpop.f32.mrf.mxu0 }
 0x25e   :  { %v1578_v49 = vsel %vm1520_vm8, %v1406_v21, 0.0 }
 0x25f   :  { %1586 = vst [vmem:[%s2627_s26 + $0x20] sm:$0xff] %v1578_v49 }
 0x265   :  { %v1409_v50 = vpop.f32.mrf.mxu0 }
 0x266   :  { %v1579_v25 = vsel %vm1520_vm8, %v1409_v50, 0.0 }
 0x267   :  { %1587 = vst [vmem:[%s2627_s26 + $0x28] sm:$0xff] %v1579_v25 }
 0x26d   :  { %v1412_v51 = vpop.f32.mrf.mxu0 }
 0x26e   :  { %v1580_v52 = vsel %vm1548_vm2, %v1412_v51, 0.0 }
 0x26f   :  { %1588 = vst [vmem:[%s2627_s26 + $0x30] sm:$0xff] %v1580_v52 }
 0x275   :  { %v1415_v53 = vpop.f32.mrf.mxu0 }
 0x276   :  { %v1581_v54 = vsel %vm1548_vm2, %v1415_v53, 0.0 }
 0x277   :  { %1589 = vst [vmem:[%s2627_s26 + $0x38] sm:$0xff] %v1581_v54 }

</bundles_post_ra>
